<compile_context>
chip_gen: v7x
topology: tpu7x:2x2x1
jax: 0.10.0
libtpu: 0.0.40
codegen_flags: <defaults>
</compile_context>

<pallas_src>
import jax
import jax.numpy as jnp
from jax.experimental import pallas as pl
from jax.experimental.pallas import tpu as pltpu


def _optee_fwd_kernel(x_ref, w_ref, b_ref, y_ref, pred_ref, part_ref):
    # One grid step handles the full batch (tm == B) and one H-column tile.
    # bf16 operands -> native-rate MXU, f32 accumulation.
    z = jnp.dot(x_ref[...], w_ref[...], preferred_element_type=jnp.float32)
    z = z + b_ref[...]                                  # f32 bias, broadcast
    pred = jnp.tanh(z)                                  # EUP transcendental, f32
    pred_ref[...] = pred.astype(pred_ref.dtype)         # bf16 store (half HBM)

    # Squared-error partial for this column tile, accumulated in f32.
    diff = pred - y_ref[...].astype(jnp.float32)
    sq = diff * diff                                    # (B, tn) f32

    # Fold down to a single (8, 128) vreg with aligned slice adds: pure VPU
    # work that co-issues with MXU/DMA — no per-step XLU cross-lane reduce and
    # no SMEM scalar RMW.  Final scalar reduce + scale happen in the wrapper.
    rows, cols = sq.shape
    folded = sq[:, :128]
    for g in range(1, cols // 128):                     # fold lanes -> 128
        folded = folded + sq[:, g * 128:(g + 1) * 128]
    part = folded[:8, :]
    for r in range(1, rows // 8):                       # fold rows -> 8
        part = part + folded[r * 8:(r + 1) * 8, :]
    part_ref[0, :, :] = part                            # per-tile partial


def optee_forward(x, w, b, y, *, tn=256):
    """Returns (pred [B,H] bf16, metrics dict with scalar f32 'loss')."""
    B, D = x.shape
    H = w.shape[1]
    assert H % tn == 0 and tn % 128 == 0 and B % 8 == 0, "bad shapes/tiling"

    # bf16 MXU operands and bf16 target/pred streams; bias and all squared-
    # error math stay f32.
    x_bf = x.astype(jnp.bfloat16)
    w_bf = w.astype(jnp.bfloat16)
    b_f32 = b.astype(jnp.float32)
    y_bf = y.astype(jnp.bfloat16)

    n_tiles = H // tn
    inv_n = 1.0 / float(B * H)

    cost = pl.CostEstimate(
        flops=2 * B * D * H,
        transcendentals=B * H,
        # x and W are each fetched exactly once under the 1-D grid.
        bytes_accessed=(x_bf.size * 2 + w_bf.size * 2 + b_f32.size * 4
                        + y_bf.size * 2 + B * H * 2 + n_tiles * 8 * 128 * 4),
    )

    pred, part = pl.pallas_call(
        _optee_fwd_kernel,
        out_shape=(
            jax.ShapeDtypeStruct((B, H), jnp.bfloat16),          # pred
            jax.ShapeDtypeStruct((n_tiles, 8, 128), jnp.float32),  # loss partials
        ),
        grid_spec=pltpu.PrefetchScalarGridSpec(
            num_scalar_prefetch=0,
            grid=(n_tiles,),
            in_specs=[
                pl.BlockSpec((B, D), lambda j: (0, 0)),    # x  (bf16, DMA'd once)
                pl.BlockSpec((D, tn), lambda j: (0, j)),   # W  (bf16, each tile once)
                pl.BlockSpec((1, tn), lambda j: (0, j)),   # b  (f32 row)
                pl.BlockSpec((B, tn), lambda j: (0, j)),   # target (bf16)
            ],
            out_specs=(
                pl.BlockSpec((B, tn), lambda j: (0, j)),        # pred (bf16)
                pl.BlockSpec((1, 8, 128), lambda j: (j, 0, 0)),  # per-tile partial
            ),
        ),
        compiler_params=pltpu.CompilerParams(
            # Per-tile partial outputs -> no cross-step carry, so the single
            # grid axis can be parallel (uses both TensorCores on v7x).
            dimension_semantics=("parallel",),
            vmem_limit_bytes=16 * 1024 * 1024,   # tiles ~1 MiB double-buffered
        ),
        cost_estimate=cost,
    )(x_bf, w_bf, b_f32, y_bf)

    loss = jnp.sum(part) * inv_n                 # single reduce, outside kernel
    return pred, {"loss": loss}


if __name__ == "__main__":
    # Many tiny optimizee instances stacked along the batch axis (32 x 8) so
    # the MXU sees a full 256-row LHS; D/H are lane-aligned multiples of 128.
    B, D, H = 256, 128, 512

    key = jax.random.PRNGKey(0)
    kx, kw, kb, ky = jax.random.split(key, 4)

    x = jax.random.normal(kx, (B, D), dtype=jnp.float32)
    w = jax.random.normal(kw, (D, H), dtype=jnp.float32) * 0.1   # deterministic init
    b = jax.random.normal(kb, (1, H), dtype=jnp.float32) * 0.01
    y = jax.random.normal(ky, (B, H), dtype=jnp.float32)

    pred, metrics = optee_forward(x, w, b, y)
    jax.block_until_ready((pred, metrics["loss"]))

    # Reference in plain JAX using the same bf16 matmul operands / bf16 target.
    z_ref = jnp.dot(x.astype(jnp.bfloat16), w.astype(jnp.bfloat16),
                    preferred_element_type=jnp.float32) + b
    pred_f32 = jnp.tanh(z_ref)
    y_bf = y.astype(jnp.bfloat16).astype(jnp.float32)
    loss_ref = jnp.mean((pred_f32 - y_bf) ** 2)

    assert jnp.allclose(pred.astype(jnp.float32), pred_f32, atol=1e-2), "pred mismatch"
    assert jnp.allclose(metrics["loss"], loss_ref, rtol=5e-3, atol=5e-3), "loss mismatch"

    print("KERNEL_OK")
</pallas_src>

<mosaic_0001>
module attributes {stable_mosaic.version = 11 : i64} {
  func.func @_optee_fwd_kernel(%arg0: i32, %arg1: memref<256x128xbf16, #tpu.memory_space<vmem>>, %arg2: memref<128x256xbf16, #tpu.memory_space<vmem>>, %arg3: memref<1x256xf32, #tpu.memory_space<vmem>>, %arg4: memref<256x256xbf16, #tpu.memory_space<vmem>>, %arg5: memref<256x256xbf16, #tpu.memory_space<vmem>>, %arg6: memref<1x8x128xf32, #tpu.memory_space<vmem>>) attributes {dimension_semantics = [#tpu.dimension_semantics<parallel>], iteration_bounds = array<i64: 2>, scalar_prefetch = 0 : i64, scratch_operands = 0 : i64, tpu.core_type = #tpu.core_type<tc>, window_params = [{pipeline_mode = #tpu.pipeline_mode<synchronous>, transform_indices = @transform_0, window_bounds = array<i64: 256, 128>}, {transform_indices = @transform_1, window_bounds = array<i64: 128, 256>}, {transform_indices = @transform_2, window_bounds = array<i64: 1, 256>}, {transform_indices = @transform_3, window_bounds = array<i64: 256, 256>}, {transform_indices = @transform_4, window_bounds = array<i64: 256, 256>}, {transform_indices = @transform_5, window_bounds = array<i64: 1, 8, 128>}]} {
    %c0 = arith.constant 0 : index
    %c0_0 = arith.constant 0 : index
    %0 = vector.load %arg1[%c0, %c0_0] : memref<256x128xbf16, #tpu.memory_space<vmem>>, vector<256x128xbf16>
    %c0_1 = arith.constant 0 : index
    %c0_2 = arith.constant 0 : index
    %1 = vector.load %arg2[%c0_1, %c0_2] : memref<128x256xbf16, #tpu.memory_space<vmem>>, vector<128x256xbf16>
    %cst = arith.constant dense<0.000000e+00> : vector<256x256xf32>
    %2 = tpu.matmul %0, %1, %cst {dimension_numbers = #tpu.dot_dimension_numbers<[1], [0], [0], [1], [0, 0, 1, 1], [], []>} : vector<256x128xbf16>, vector<128x256xbf16>, vector<256x256xf32> -> vector<256x256xf32>
    %c0_3 = arith.constant 0 : index
    %c0_4 = arith.constant 0 : index
    %3 = vector.load %arg3[%c0_3, %c0_4] : memref<1x256xf32, #tpu.memory_space<vmem>>, vector<1x256xf32>
    %4 = vector.broadcast %3 : vector<1x256xf32> to vector<256x256xf32>
    %5 = arith.addf %2, %4 : vector<256x256xf32>
    %6 = math.tanh %5 : vector<256x256xf32>
    %7 = arith.truncf %6 : vector<256x256xf32> to vector<256x256xbf16>
    %c0_5 = arith.constant 0 : index
    %c0_6 = arith.constant 0 : index
    %8 = vector.load %arg5[%c0_5, %c0_6] : memref<256x256xbf16, #tpu.memory_space<vmem>>, vector<256x256xbf16>
    tpu.vector_store %arg5[%c0_5, %c0_6], %7 {strides = array<i32>} : memref<256x256xbf16, #tpu.memory_space<vmem>>, vector<256x256xbf16>,
    %c0_7 = arith.constant 0 : index
    %c0_8 = arith.constant 0 : index
    %9 = vector.load %arg4[%c0_7, %c0_8] : memref<256x256xbf16, #tpu.memory_space<vmem>>, vector<256x256xbf16>
    %10 = arith.extf %9 : vector<256x256xbf16> to vector<256x256xf32>
    %11 = arith.subf %6, %10 : vector<256x256xf32>
    %12 = arith.mulf %11, %11 : vector<256x256xf32>
    %13 = vector.extract_strided_slice %12 {offsets = [0, 0], sizes = [256, 128], strides = [1, 1]} : vector<256x256xf32> to vector<256x128xf32>
    %14 = vector.extract_strided_slice %12 {offsets = [0, 128], sizes = [256, 128], strides = [1, 1]} : vector<256x256xf32> to vector<256x128xf32>
    %15 = arith.addf %13, %14 : vector<256x128xf32>
    %16 = vector.extract_strided_slice %15 {offsets = [0, 0], sizes = [8, 128], strides = [1, 1]} : vector<256x128xf32> to vector<8x128xf32>
    %17 = vector.extract_strided_slice %15 {offsets = [8, 0], sizes = [8, 128], strides = [1, 1]} : vector<256x128xf32> to vector<8x128xf32>
    %18 = arith.addf %16, %17 : vector<8x128xf32>
    %19 = vector.extract_strided_slice %15 {offsets = [16, 0], sizes = [8, 128], strides = [1, 1]} : vector<256x128xf32> to vector<8x128xf32>
    %20 = arith.addf %18, %19 : vector<8x128xf32>
    %21 = vector.extract_strided_slice %15 {offsets = [24, 0], sizes = [8, 128], strides = [1, 1]} : vector<256x128xf32> to vector<8x128xf32>
    %22 = arith.addf %20, %21 : vector<8x128xf32>
    %23 = vector.extract_strided_slice %15 {offsets = [32, 0], sizes = [8, 128], strides = [1, 1]} : vector<256x128xf32> to vector<8x128xf32>
    %24 = arith.addf %22, %23 : vector<8x128xf32>
    %25 = vector.extract_strided_slice %15 {offsets = [40, 0], sizes = [8, 128], strides = [1, 1]} : vector<256x128xf32> to vector<8x128xf32>
    %26 = arith.addf %24, %25 : vector<8x128xf32>
    %27 = vector.extract_strided_slice %15 {offsets = [48, 0], sizes = [8, 128], strides = [1, 1]} : vector<256x128xf32> to vector<8x128xf32>
    %28 = arith.addf %26, %27 : vector<8x128xf32>
    %29 = vector.extract_strided_slice %15 {offsets = [56, 0], sizes = [8, 128], strides = [1, 1]} : vector<256x128xf32> to vector<8x128xf32>
    %30 = arith.addf %28, %29 : vector<8x128xf32>
    %31 = vector.extract_strided_slice %15 {offsets = [64, 0], sizes = [8, 128], strides = [1, 1]} : vector<256x128xf32> to vector<8x128xf32>
    %32 = arith.addf %30, %31 : vector<8x128xf32>
    %33 = vector.extract_strided_slice %15 {offsets = [72, 0], sizes = [8, 128], strides = [1, 1]} : vector<256x128xf32> to vector<8x128xf32>
    %34 = arith.addf %32, %33 : vector<8x128xf32>
    %35 = vector.extract_strided_slice %15 {offsets = [80, 0], sizes = [8, 128], strides = [1, 1]} : vector<256x128xf32> to vector<8x128xf32>
    %36 = arith.addf %34, %35 : vector<8x128xf32>
    %37 = vector.extract_strided_slice %15 {offsets = [88, 0], sizes = [8, 128], strides = [1, 1]} : vector<256x128xf32> to vector<8x128xf32>
    %38 = arith.addf %36, %37 : vector<8x128xf32>
    %39 = vector.extract_strided_slice %15 {offsets = [96, 0], sizes = [8, 128], strides = [1, 1]} : vector<256x128xf32> to vector<8x128xf32>
    %40 = arith.addf %38, %39 : vector<8x128xf32>
    %41 = vector.extract_strided_slice %15 {offsets = [104, 0], sizes = [8, 128], strides = [1, 1]} : vector<256x128xf32> to vector<8x128xf32>
    %42 = arith.addf %40, %41 : vector<8x128xf32>
    %43 = vector.extract_strided_slice %15 {offsets = [112, 0], sizes = [8, 128], strides = [1, 1]} : vector<256x128xf32> to vector<8x128xf32>
    %44 = arith.addf %42, %43 : vector<8x128xf32>
    %45 = vector.extract_strided_slice %15 {offsets = [120, 0], sizes = [8, 128], strides = [1, 1]} : vector<256x128xf32> to vector<8x128xf32>
    %46 = arith.addf %44, %45 : vector<8x128xf32>
    %47 = vector.extract_strided_slice %15 {offsets = [128, 0], sizes = [8, 128], strides = [1, 1]} : vector<256x128xf32> to vector<8x128xf32>
    %48 = arith.addf %46, %47 : vector<8x128xf32>
    %49 = vector.extract_strided_slice %15 {offsets = [136, 0], sizes = [8, 128], strides = [1, 1]} : vector<256x128xf32> to vector<8x128xf32>
    %50 = arith.addf %48, %49 : vector<8x128xf32>
    %51 = vector.extract_strided_slice %15 {offsets = [144, 0], sizes = [8, 128], strides = [1, 1]} : vector<256x128xf32> to vector<8x128xf32>
    %52 = arith.addf %50, %51 : vector<8x128xf32>
    %53 = vector.extract_strided_slice %15 {offsets = [152, 0], sizes = [8, 128], strides = [1, 1]} : vector<256x128xf32> to vector<8x128xf32>
    %54 = arith.addf %52, %53 : vector<8x128xf32>
    %55 = vector.extract_strided_slice %15 {offsets = [160, 0], sizes = [8, 128], strides = [1, 1]} : vector<256x128xf32> to vector<8x128xf32>
    %56 = arith.addf %54, %55 : vector<8x128xf32>
    %57 = vector.extract_strided_slice %15 {offsets = [168, 0], sizes = [8, 128], strides = [1, 1]} : vector<256x128xf32> to vector<8x128xf32>
    %58 = arith.addf %56, %57 : vector<8x128xf32>
    %59 = vector.extract_strided_slice %15 {offsets = [176, 0], sizes = [8, 128], strides = [1, 1]} : vector<256x128xf32> to vector<8x128xf32>
    %60 = arith.addf %58, %59 : vector<8x128xf32>
    %61 = vector.extract_strided_slice %15 {offsets = [184, 0], sizes = [8, 128], strides = [1, 1]} : vector<256x128xf32> to vector<8x128xf32>
    %62 = arith.addf %60, %61 : vector<8x128xf32>
    %63 = vector.extract_strided_slice %15 {offsets = [192, 0], sizes = [8, 128], strides = [1, 1]} : vector<256x128xf32> to vector<8x128xf32>
    %64 = arith.addf %62, %63 : vector<8x128xf32>
    %65 = vector.extract_strided_slice %15 {offsets = [200, 0], sizes = [8, 128], strides = [1, 1]} : vector<256x128xf32> to vector<8x128xf32>
    %66 = arith.addf %64, %65 : vector<8x128xf32>
    %67 = vector.extract_strided_slice %15 {offsets = [208, 0], sizes = [8, 128], strides = [1, 1]} : vector<256x128xf32> to vector<8x128xf32>
    %68 = arith.addf %66, %67 : vector<8x128xf32>
    %69 = vector.extract_strided_slice %15 {offsets = [216, 0], sizes = [8, 128], strides = [1, 1]} : vector<256x128xf32> to vector<8x128xf32>
    %70 = arith.addf %68, %69 : vector<8x128xf32>
    %71 = vector.extract_strided_slice %15 {offsets = [224, 0], sizes = [8, 128], strides = [1, 1]} : vector<256x128xf32> to vector<8x128xf32>
    %72 = arith.addf %70, %71 : vector<8x128xf32>
    %73 = vector.extract_strided_slice %15 {offsets = [232, 0], sizes = [8, 128], strides = [1, 1]} : vector<256x128xf32> to vector<8x128xf32>
    %74 = arith.addf %72, %73 : vector<8x128xf32>
    %75 = vector.extract_strided_slice %15 {offsets = [240, 0], sizes = [8, 128], strides = [1, 1]} : vector<256x128xf32> to vector<8x128xf32>
    %76 = arith.addf %74, %75 : vector<8x128xf32>
    %77 = vector.extract_strided_slice %15 {offsets = [248, 0], sizes = [8, 128], strides = [1, 1]} : vector<256x128xf32> to vector<8x128xf32>
    %78 = arith.addf %76, %77 : vector<8x128xf32>
    %c0_9 = arith.constant 0 : index
    %c0_10 = arith.constant 0 : index
    %c0_11 = arith.constant 0 : index
    %79 = vector.load %arg6[%c0_9, %c0_10, %c0_11] : memref<1x8x128xf32, #tpu.memory_space<vmem>>, vector<1x8x128xf32>
    %80 = vector.shape_cast %79 : vector<1x8x128xf32> to vector<8x128xf32>
    %81 = vector.shape_cast %78 : vector<8x128xf32> to vector<1x8x128xf32>
    tpu.vector_store %arg6[%c0_9, %c0_10, %c0_11], %81 {strides = array<i32>} : memref<1x8x128xf32, #tpu.memory_space<vmem>>, vector<1x8x128xf32>,
    return
  }
  func.func @transform_0(%arg0: i32) -> (i32, i32) {
    %c0_i32 = arith.constant 0 : i32
    %c0_i32_0 = arith.constant 0 : i32
    %c0_i32_1 = arith.constant 0 : i32
    return %c0_i32, %c0_i32_0 : i32, i32
  }
  func.func @transform_1(%arg0: i32) -> (i32, i32) {
    %c0_i32 = arith.constant 0 : i32
    %c0_i32_0 = arith.constant 0 : i32
    return %c0_i32, %arg0 : i32, i32
  }
  func.func @transform_2(%arg0: i32) -> (i32, i32) {
    %c0_i32 = arith.constant 0 : i32
    %c0_i32_0 = arith.constant 0 : i32
    return %c0_i32, %arg0 : i32, i32
  }
  func.func @transform_3(%arg0: i32) -> (i32, i32) {
    %c0_i32 = arith.constant 0 : i32
    %c0_i32_0 = arith.constant 0 : i32
    return %c0_i32, %arg0 : i32, i32
  }
  func.func @transform_4(%arg0: i32) -> (i32, i32) {
    %c0_i32 = arith.constant 0 : i32
    %c0_i32_0 = arith.constant 0 : i32
    return %c0_i32, %arg0 : i32, i32
  }
  func.func @transform_5(%arg0: i32) -> (i32, i32, i32) {
    %c0_i32 = arith.constant 0 : i32
    %c0_i32_0 = arith.constant 0 : i32
    %c0_i32_1 = arith.constant 0 : i32
    return %arg0, %c0_i32, %c0_i32_0 : i32, i32, i32
  }
}

</mosaic_0001>

<bundles_post_ra>
// kernel: tpu_custom_call.1
= control target key start
LH: loop header
LB: loop body
LE: loop exit
PB: predicated region body
PF: predicated region fallthrough
CT: control target
= control target key end

     0   :  { %11 = vsyncpa [#allocation3], 0  ;;  %s2945_s0 = inlined_call_operand.hbm [shape: bf16[256,128], index: 0, kind: input, shape index: {}]   ;;  %s2946_s1 = inlined_call_operand.hbm [shape: bf16[128,512], index: 1, kind: input, shape index: {}]   ;;  %s2947_s2 = inlined_call_operand.vmem [shape: f32[1,512], index: 2, kind: input, shape index: {}]   ;;  %s2948_s3 = inlined_call_operand.hbm [shape: bf16[256,512], index: 3, kind: input, shape index: {}]   ;;  %s2949_s4 = inlined_call_operand.hbm [shape: bf16[256,512], index: 4, kind: output, shape index: {0}]   ;;  %s2950_s5 = inlined_call_operand.hbm [shape: f32[2,8,128], index: 5, kind: output, shape index: {1}]  }
   0x1   :  { %12 = vsyncpa [#allocation6], 0 }
   0x2   :  { %14 = vsyncpa [#allocation6 + $0x1], 0 }
   0x3   :  { %15 = vsyncpa [#allocation4], 0 }
   0x4   :  { %17 = vsyncpa [#allocation4 + $0x1], 0 }
   0x5   :  { %18 = vsyncpa [#allocation10], 0 }
   0x6   :  { %20 = vsyncpa [#allocation10 + $0x1], 0  ;;  %s2131_s18 = smov 0   ;;  %s2133_s19 = smov 0  }
   0x7   :  { %s2135_s20 = smov 0   ;;  %s2137_s21 = smov 0  }
   0x8 LB: > { %s2152_s22 = sadd.s32 1, %s2085_s21   ;;  %s54_s23 = sadd.s32 1, %s2081_s20  ;;  %s2085_s21 = sphi %s2137_s21, %s3011_s21   ;;  %s2081_s20 = sphi %s2135_s20, %s3010_s20   ;;  %s2077_s19 = sphi %s2133_s19, %s3009_s19   ;;  %s2073_s18 = sphi %s2131_s18, %s3008_s18  }
   0x9   : > { %s51_s24 = ssub.s32 %s2085_s21, %s2152_s22  ;;  %p61_p0 = scmp.ne.s32.totalorder %s2081_s20, %s2077_s19 }
   0xa   : > { %p52_p1 = scmp.eq.s32.totalorder %s51_s24, 0  ;;  %p62_p2 = scmp.eq.s32.totalorder %s2085_s21, 0 }
   0xb   : > { %p1682_p4 = scmp.lt.s32.totalorder %s2085_s21, 2  ;;  %s208_s26 = sand.u32 1, %s2085_s21  }
   0xc   : > { %s2163_s25 = scalar_select %p52_p1, %s2081_s20, %s54_s23  }
   0xd   : > { %p63_p5 = por %p62_p2, %p61_p0  ;;  %s210_s27 = sand.u32 1, %s2081_s20  }
   0xe   : > { %s1516_s28 = sshll.u32 %s210_s27, 7  ;;  %s1600_s29 = sshll.u32 %s2085_s21, 7 }
   0xf   : > { %s2176_s7 = scalar_lea.hbm %s2946_s1, %s1600_s29  ;;  %s212_s8 = scalar_lea.vmem [#allocation5], %s1516_s28 }
  0x10   : > { %s219_s9 = sshll.u32 %s212_s8, 4  ;;  %p2178_p6 = pnand %p1682_p4, %p63_p5  ;;  %s2182_s9 = int_to_ptr.vmem [resolvable:$true] %s219_s9 }
  0x11   : > { %s2184_s11 = sshll.u32 %s210_s27, 8  ;;  %s2186_s12 = scalar_lea.sflag [#allocation6], %s208_s26 }
  0x12   : > { %s1895_s13 = scalar_lea.hbm %s2176_s7, 2048  ;;  %p1897_p8 = pneg %p2178_p6 }
  0x13   : > { %p1896_p7 = scmp.ne.s32.totalorder %s2176_s7, %s1895_s13  ;;  %s1900_s16 = scalar_lea.hbm %s2946_s1, 4096 }
  0x14   : > { %p1901_p11 = scmp.lt.u32.totalorder %s2176_s7, %s2946_s1  ;;  %p1902_p12 = scmp.lt.u32.totalorder %s1900_s16, %s1895_s13 }
  0x15   : > { %p1898_p9 = pnand %p1897_p8, %p1896_p7  ;;  %p1904_p1 = scmp.lt.u32.totalorder %s1895_s13, %s2176_s7 }
  0x16   : > { %p1903_p13 = por %p1902_p12, %p1901_p11 }
  0x17   : > { %p1899_p10 = pneg %p1898_p9 }
  0x18   : > { %p1905_p2 = por %p1904_p1, %p1903_p13 }
  0x1a   : > { %p1906_p4 = pnand %p1905_p2, %p1899_p10 }
  0x1c   : > { %1909 = shalt.err (!%p1906_p4)
}
  0x1d   : > { %s1910_s24 = scalar_lea.vmem %s2182_s9, 2048  ;;  %s2087_s26 = smov [#allocation5]  }
  0x1e   : > { %p1911_p5 = scmp.ne.s32.totalorder %s2182_s9, %s1910_s24  ;;  %s1915_s27 = sshll.u32 %s2087_s26, 4  ;;  %s1916_s27 = int_to_ptr.vmem [resolvable:$false] %s1915_s27 }
  0x1f   : > { %s1917_s28 = scalar_lea.vmem %s1916_s27, 4096  ;;  %p1918_p3 = scmp.lt.s32.totalorder %s2182_s9, %s1916_s27 }
  0x20   : > { %p1913_p7 = pnand %p1911_p5, %p1897_p8  ;;  %p1919_p11 = scmp.lt.s32.totalorder %s1917_s28, %s1910_s24 }
  0x22   : > { %p1914_p9 = pneg %p1913_p7  ;;  %p1920_p12 = por %p1919_p11, %p1918_p3 }
  0x24   : > { %p1921_p13 = pnand %p1920_p12, %p1914_p9 }
  0x26   : > { %1924 = shalt.err (!%p1921_p13)
}
  0x27   : > { %s2951_s30 = smov 256   ;;  %s2089_s6 = smov 128  }
  0x28   : > { %s2090_s8 = smov 8   ;;  %s2222_s15 = scalar_lea.hbm %s2948_s3, %s1600_s29 }
  0x29   : > { %1670 = dma.hbm_to_vmem [thread:$0]  (!%p2178_p6), %s2176_s7, 2048, %s2182_s9, %s2186_s12, %s2951_s30, %s2089_s6, %s2090_s8  }
  0x2a   : > { %s241_s16 = scalar_lea.vmem [#allocation7], %s2184_s11  ;;  %s2226_s23 = sadd.s32 4294967295, %s2085_s21  }
  0x2b   : > { %s248_s17 = sshll.u32 %s241_s16, 4  ;;  %s1512_s24 = sadd.s32 4294967294, %s2085_s21   ;;  %s2252_s17 = int_to_ptr.vmem [resolvable:$true] %s248_s17 }
  0x2c   : > { %p67_p3 = scmp.ne.s32.totalorder %s2077_s19, %s2073_s18  ;;  %p2952_p10 = scmp.eq.s32.totalorder %s2226_s23, 0 }
  0x2d   : > { %p143_p1 = scmp.eq.s32.totalorder %s2226_s23, 1  ;;  %p149_p2 = scmp.eq.s32.totalorder %s1512_s24, 1 }
  0x2e   : > { %p2235_p4 = por %p2952_p10, %p67_p3  ;;  %p1513_p5 = scmp.ge.s32.totalorder %s2085_s21, 1 }
  0x2f   : > { %p2243_p7 = por %p143_p1, %p61_p0  ;;  %p2247_p9 = por %p149_p2, %p67_p3 }
  0x30   : > { %s2957_s7 = scalar_select %p2235_p4, 1, 0 }
  0x31   : > { %s2958_s29 = scalar_select %p2243_p7, 1, 0 }
  0x32   : > { %s2959_s9 = scalar_select %p2247_p9, 1, 0 }
  0x33   : > { %p182_p11 = scmp.lt.s32.totalorder %s2085_s21, 3  ;;  %s2091_s26 = smov [#allocation2]  }
  0x34   : > { %s194_s27 = sshll.u32 %s2091_s26, 4  ;;  %s1925_s28 = scalar_lea.hbm %s2222_s15, 4096  ;;  %s2260_s27 = int_to_ptr.vmem [resolvable:$true] %s194_s27 }
  0x35   : > { %p2254_p12 = pnand %p1513_p5, %p182_p11  ;;  %p1926_p13 = scmp.ne.s32.totalorder %s2222_s15, %s1925_s28 }
  0x36   : > { %s1930_s16 = scalar_lea.hbm %s2948_s3, 8192  ;;  %p1931_p2 = scmp.lt.u32.totalorder %s2222_s15, %s2948_s3 }
  0x37   : > { %s2960_s11 = scalar_select %p2254_p12, 1, 0 }
  0x38   : > { %p1928_p3 = pnand %p1926_p13, %p1897_p8  ;;  %p1932_p5 = scmp.lt.u32.totalorder %s1930_s16, %s1925_s28 }
  0x39   : > { %p1934_p10 = scmp.lt.u32.totalorder %s1925_s28, %s2222_s15 }
  0x3a   : > { %p1929_p1 = pneg %p1928_p3  ;;  %p1933_p11 = por %p1932_p5, %p1931_p2 }
  0x3c   : > { %p1935_p0 = por %p1934_p10, %p1933_p11 }
  0x3e   : > { %p1936_p9 = pnand %p1935_p0, %p1929_p1 }
  0x40   : > { %1939 = shalt.err (!%p1936_p9)
}
  0x41   : > { %s1940_s26 = scalar_lea.vmem %s2252_s17, 4096  ;;  %s2092_s13 = smov [#allocation7]  }
  0x42   : > { %p1941_p13 = scmp.ne.s32.totalorder %s2252_s17, %s1940_s26  ;;  %s1945_s14 = sshll.u32 %s2092_s13, 4  ;;  %s1946_s14 = int_to_ptr.vmem [resolvable:$false] %s1945_s14 }
  0x43   : > { %s1947_s30 = scalar_lea.vmem %s1946_s14, 8192  ;;  %p1948_p4 = scmp.lt.s32.totalorder %s2252_s17, %s1946_s14 }
  0x44   : > { %p1943_p3 = pnand %p1941_p13, %p1897_p8  ;;  %p1949_p2 = scmp.lt.s32.totalorder %s1947_s30, %s1940_s26 }
  0x46   : > { %p1944_p7 = pneg %p1943_p3  ;;  %p1950_p5 = por %p1949_p2, %p1948_p4 }
  0x48   : > { %p1951_p10 = pnand %p1950_p5, %p1944_p7 }
  0x4a   : > { %1954 = shalt.err (!%p1951_p10)
}
  0x4b   : > { %s2961_s28 = smov 256   ;;  %p2962_p8 = scmp.eq.s32.totalorder %s2226_s23, 0 }
  0x4c   : > { %1673 = dma.hbm_to_vmem [thread:$0]  (!%p2178_p6), %s2222_s15, 4096, %s2252_s17, %s2186_s12, %s2961_s28, %s2089_s6, %s2090_s8  }
  0x4d   : > { %p2963_p9 = pneg %p2254_p12  ;;  %s1955_s10 = scalar_lea.hbm %s2945_s0, 2048 }
  0x4e   : > { %p1956_p4 = scmp.ne.s32.totalorder %s2945_s0, %s1955_s10  ;;  %p1962_p11 = scmp.lt.u32.totalorder %s1955_s10, %s2945_s0 }
  0x4f   : > { %p2294_p0 = pnand %p2963_p9, %p2962_p8 }
  0x51   : > { %p1957_p7 = pneg %p2294_p0 }
  0x53   : > { %p1958_p1 = pnand %p1957_p7, %p1956_p4 }
  0x55   : > { %p1959_p6 = pneg %p1958_p1 }
  0x57   : > { %p1964_p13 = pnand %p1962_p11, %p1959_p6 }
  0x59   : > { %1967 = shalt.err (!%p1964_p13)
}
  0x5a   : > { %s1968_s8 = scalar_lea.vmem %s2260_s27, 2048  ;;  %p1976_p10 = scmp.lt.s32.totalorder %s2260_s27, %s2260_s27 }
  0x5b   : > { %p1969_p3 = scmp.ne.s32.totalorder %s2260_s27, %s1968_s8  ;;  %p1977_p8 = scmp.lt.s32.totalorder %s1968_s8, %s1968_s8 }
  0x5d   : > { %p1971_p2 = pnand %p1969_p3, %p1957_p7  ;;  %p1978_p9 = por %p1977_p8, %p1976_p10 }
  0x5f   : > { %p1972_p5 = pneg %p1971_p2 }
  0x61   : > { %p1979_p12 = pnand %p1978_p9, %p1972_p5 }
  0x63   : > { %1982 = shalt.err (!%p1979_p12)
}
  0x64   : > { %s2093_s15 = smov 64   ;;  %s2094_s17 = smov 4  }
  0x65   : > { %1666 = dma.hbm_to_vmem [thread:$0]  (!%p2294_p0), %s2945_s0, 2048, %s2260_s27, [#allocation3], %s2093_s15, %s2093_s15, %s2094_s17  }
  0x66   : > { %p2965_p4 = scmp.ne.s32.totalorder %s2960_s11, 0 }
  0x67   : > { %p2966_p7 = scmp.eq.s32.totalorder (!%p2965_p4), %s2226_s23, 0 }
  0x68   : > { %260 = sbr.rel (%p2965_p4) target bundleno = 515 (0x203), region = 36 }
  0x6f   : > { %2056 = dma.done.wait (%p2966_p7), [#allocation3], 2048   ;;  %p2967_p1 = pmov %p2966_p7 }
  0x70   : > { %s266_s24 = sand.u32 1, %s2226_s23   ;;  %s2327_s26 = sand.u32 1, %s2077_s19  }
  0x71   : > { %2058 = vsyncadd (%p2967_p1), [#allocation3], 4294965248  ;;  %s1524_s16 = sshll.u32 %s2327_s26, 7  ;;  %s267_s10 = scalar_lea.sflag [#allocation6], %s266_s24 }
  0x72   : > { %s2330_s13 = scalar_lea.vmem [#allocation5], %s1524_s16  ;;  %p2968_p12 = scmp.ne.s32.totalorder %s2957_s7, 0 }
  0x74   : > { %2060 = dma.done.wait (%p2968_p12), %s267_s10, 6144  }
  0x75   : > { %2062 = vsyncadd (%p2968_p12), %s267_s10, 4294961152  ;;  %v2095_v0 = vmov 0   ;;  %v1727_v1 = vld [vmem:[%s2330_s13 + $0x4] ss:$8 sps:$4 sm:$0xff]   ;;  %v1729_v2 = vld [vmem:[%s2330_s13] ss:$8 sps:$4 sm:$0xff]   ;;  %v379_v33 = vlaneseq }
  0x76   : > { %597 = vmatprep.mubr.bf16.mxu0 %v2095_v0  ;;  %677 = vmatprep.mubr.bf16.mxu1 %v2095_v0  ;;  %v1730_v3 = vld [vmem:[%s2330_s13 + $0x14] ss:$8 sps:$4 sm:$0xff]   ;;  %v1732_v4 = vld [vmem:[%s2330_s13 + $0x10] ss:$8 sps:$4 sm:$0xff]   ;;  %v1733_v5 = vld [vmem:[%s2330_s13 + $0x24] ss:$8 sps:$4 sm:$0xff]  }
  0x77   : > { %565 = vmatprep.subr.bf16.mxu0 %v1727_v1  ;;  %1635 = vmatprep.subr.bf16.mxu1 %v1727_v1  ;;  %v1735_v6 = vld [vmem:[%s2330_s13 + $0x20] ss:$8 sps:$4 sm:$0xff]   ;;  %v1736_v7 = vld [vmem:[%s2330_s13 + $0x34] ss:$8 sps:$4 sm:$0xff]   ;;  %v1738_v8 = vld [vmem:[%s2330_s13 + $0x30] ss:$8 sps:$4 sm:$0xff]  }
  0x78   : > { %566 = vmatpush1.bf16.msra.mxu0 %v1729_v2  ;;  %1643 = vmatpush1.bf16.msra.mxu1 %v1729_v2  ;;  %v1739_v9 = vld [vmem:[%s2330_s13 + $0x44] ss:$8 sps:$4 sm:$0xff]   ;;  %v1741_v10 = vld [vmem:[%s2330_s13 + $0x40] ss:$8 sps:$4 sm:$0xff]   ;;  %v1742_v11 = vld [vmem:[%s2330_s13 + $0x54] ss:$8 sps:$4 sm:$0xff]  }
  0x79   : > { %567 = vmatprep.subr.bf16.mxu0 %v1730_v3  ;;  %1636 = vmatprep.subr.bf16.mxu1 %v1730_v3  ;;  %v1744_v12 = vld [vmem:[%s2330_s13 + $0x50] ss:$8 sps:$4 sm:$0xff]   ;;  %v1745_v13 = vld [vmem:[%s2330_s13 + $0x64] ss:$8 sps:$4 sm:$0xff]   ;;  %v1747_v14 = vld [vmem:[%s2330_s13 + $0x60] ss:$8 sps:$4 sm:$0xff]  }
  0x7a   : > { %v1748_v15 = vld [vmem:[%s2330_s13 + $0x74] ss:$8 sps:$4 sm:$0xff]   ;;  %v1750_v16 = vld [vmem:[%s2330_s13 + $0x70] ss:$8 sps:$4 sm:$0xff]   ;;  %v1751_v17 = vld [vmem:[#allocation2] sm:$0xff]   ;;  %s1528_s7 = sshll.u32 %s2226_s23, 1 }
  0x7b   : > { %v1755_v18 = vld [vmem:[#allocation2 + $0x40] sm:$0xff]   ;;  %v1752_v19 = vld [vmem:[#allocation2 + $0x8] sm:$0xff]   ;;  %v1753_v21 = vld [vmem:[#allocation2 + $0x10] sm:$0xff]   ;;  %p322_p0 = scmp.lt.s32.totalorder %s1528_s7, 3  ;;  %s1525_s11 = sshll.u32 %s2327_s26, 8  ;;  %v380_v34 = vshrl.u32 %v379_v33, 7 }
  0x7c   : > { %568 = vmatpush1.bf16.msra.mxu0 %v1732_v4  ;;  %1644 = vmatpush1.bf16.msra.mxu1 %v1732_v4  ;;  %v1757_v20 = vld [vmem:[#allocation2 + $0x48] sm:$0xff]   ;;  %v1759_v22 = vld [vmem:[#allocation2 + $0x50] sm:$0xff]   ;;  %v1754_v23 = vld [vmem:[#allocation2 + $0x18] sm:$0xff]   ;;  %s2375_s6 = scalar_lea.vmem [#allocation7], %s1525_s11  ;;  %s2539_s8 = scalar_lea.vmem [#allocation8], %s1525_s11 }
  0x7d   : > { %569 = vmatprep.subr.bf16.mxu0 %v1733_v5  ;;  %1637 = vmatprep.subr.bf16.mxu1 %v1733_v5  ;;  %v1761_v24 = vld [vmem:[#allocation2 + $0x58] sm:$0xff]   ;;  %v1756_v25 = vld [vmem:[#allocation2 + $0x20] sm:$0xff]   ;;  %v1758_v27 = vld [vmem:[#allocation2 + $0x28] sm:$0xff]   ;;  %s3013_s7 = smov (!%p322_p0, %s1528_s7), 3  ;;  %v381_v35 = vsub.s32 0, %v380_v34  ;;  %v385_v37 = vsub.s32 1, %v380_v34 }
  0x7e   : > { %v1763_v26 = vld [vmem:[#allocation2 + $0x60] sm:$0xff]   ;;  %v1764_v28 = vld [vmem:[#allocation2 + $0x68] sm:$0xff]   ;;  %v1760_v29 = vld [vmem:[#allocation2 + $0x30] sm:$0xff]   ;;  %s324_s12 = scalar_lea.vmem %s2947_s2, %s3013_s7  ;;  %s1634_s15 = sshll.u32 %s2226_s23, 7 }
  0x7f   : > { %v1765_v30 = vld [vmem:[#allocation2 + $0x70] sm:$0xff]   ;;  %v1762_v31 = vld [vmem:[#allocation2 + $0x38] sm:$0xff]   ;;  %v377_v36 = vld [vmem:[%s324_s12] sm:$0x3]  ;;  %s1353_s17 = sshll.u32 %s2539_s8, 4  ;;  %s2859_s24 = scalar_lea.hbm %s2949_s4, %s1634_s15  ;;  %s2861_s17 = int_to_ptr.vmem [resolvable:$true] %s1353_s17 }
  0x80   : > { %570 = vmatpush1.bf16.msra.mxu0 %v1735_v6  ;;  %1645 = vmatpush1.bf16.msra.mxu1 %v1735_v6  ;;  %v1766_v32 = vld [vmem:[#allocation2 + $0x78] sm:$0xff]   ;;  %v2378_v38 = vld [vmem:[%s2375_s6] sm:$0xff]  ;;  %v2381_v39 = vld [vmem:[%s2375_s6 + $0x8] sm:$0xff]  ;;  %v2389_v42 = vrot.slane %v377_v36, %v381_v35  ;;  %v2398_v46 = vrot.slane %v377_v36, %v385_v37  ;;  %s1335_s16 = scalar_lea.sflag [#allocation4], %s2327_s26  ;;  %s1983_s10 = scalar_lea.vmem %s2861_s17, 4096 }
  0x81   : > { %571 = vmatprep.subr.bf16.mxu0 %v1736_v7  ;;  %1638 = vmatprep.subr.bf16.mxu1 %v1736_v7  ;;  %v2384_v40 = vld [vmem:[%s2375_s6 + $0x10] sm:$0xff]  ;;  %v2387_v41 = vld [vmem:[%s2375_s6 + $0x18] sm:$0xff]  ;;  %v2392_v43 = vld [vmem:[%s2375_s6 + $0x20] sm:$0xff]  ;;  %v1078_v45 = vunpack.c.l.bf16 %v2378_v38  ;;  %v1079_v47 = vunpack.c.h.bf16 %v2378_v38  ;;  %v1080_v48 = vunpack.c.l.bf16 %v2381_v39  ;;  %v1081_v51 = vunpack.c.h.bf16 %v2381_v39  ;;  %p1984_p6 = scmp.ne.s32.totalorder %s2861_s17, %s1983_s10  ;;  %p3005_p11 = scmp.ne.s32.totalorder %s2958_s29, 0 }
  0x82   : > { %v2395_v44 = vld [vmem:[%s2375_s6 + $0x28] sm:$0xff]  ;;  %v2403_v49 = vld [vmem:[%s2375_s6 + $0x30] sm:$0xff]  ;;  %v2406_v50 = vld [vmem:[%s2375_s6 + $0x38] sm:$0xff]  ;;  %v1082_v52 = vunpack.c.l.bf16 %v2384_v40  ;;  %v1083_v53 = vunpack.c.h.bf16 %v2384_v40  ;;  %v1084_v54 = vunpack.c.l.bf16 %v2387_v41  ;;  %v1085_v57 = vunpack.c.h.bf16 %v2387_v41  ;;  %s2096_s13 = smov [#allocation8]  }
  0x83   : > { %v2413_v55 = vld [vmem:[%s2375_s6 + $0x80] sm:$0xff]  ;;  %v2416_v56 = vld [vmem:[%s2375_s6 + $0x88] sm:$0xff]  ;;  %v1086_v58 = vunpack.c.l.bf16 %v2392_v43  ;;  %v1087_v59 = vunpack.c.h.bf16 %v2392_v43  ;;  %v2433_v3 = vld [vmem:[%s2375_s6 + $0x90] sm:$0xff]  ;;  %p1985_p13 = pnand %p1984_p6, %p3005_p11  ;;  %s1987_s7 = sshll.u32 %s2096_s13, 4  ;;  %s1988_s7 = int_to_ptr.vmem [resolvable:$false] %s1987_s7 }
  0x84   : > { %572 = vmatpush1.bf16.msra.mxu0 %v1738_v8  ;;  %1646 = vmatpush1.bf16.msra.mxu1 %v1738_v8  ;;  %v2423_v61 = vld [vmem:[%s2375_s6 + $0x40] sm:$0xff]  ;;  %v2426_v62 = vld [vmem:[%s2375_s6 + $0x48] sm:$0xff]  ;;  %v1110_v5 = vunpack.c.l.bf16 %v2413_v55  ;;  %v1111_v6 = vunpack.c.h.bf16 %v2413_v55  ;;  %v1112_v7 = vunpack.c.l.bf16 %v2416_v56  ;;  %v2440_v8 = vld [vmem:[%s2375_s6 + $0x98] sm:$0xff]  ;;  %s1989_s11 = scalar_lea.vmem %s1988_s7, 8192  ;;  %p1990_p2 = scmp.lt.s32.totalorder %s2861_s17, %s1988_s7 }
  0x85   : > { %573 = vmatprep.subr.bf16.mxu0 %v1739_v9  ;;  %1639 = vmatprep.subr.bf16.mxu1 %v1739_v9  ;;  %v2443_v9 = vld [vmem:[%s2375_s6 + $0x50] sm:$0xff]  ;;  %v2467_v35 = vld [vmem:[%s2375_s6 + $0xa8] sm:$0xff]  ;;  %p1986_p3 = pneg %p1985_p13  ;;  %p1991_p5 = scmp.lt.s32.totalorder %s1989_s11, %s1983_s10 }
  0x86   : > { %v2479_v34 = vld [vmem:[%s2375_s6 + $0x68] sm:$0xff] }
  0x87   : > { %v2515_v2 = vld [vmem:[%s2375_s6 + $0xc8] sm:$0xff]  ;;  %p1992_p10 = por %p1991_p5, %p1990_p2 }
  0x88   : > { %574 = vmatpush1.bf16.msra.mxu0 %v1741_v10  ;;  %1647 = vmatpush1.bf16.msra.mxu1 %v1741_v10 }
  0x89   : > { %575 = vmatprep.subr.bf16.mxu0 %v1742_v11  ;;  %1640 = vmatprep.subr.bf16.mxu1 %v1742_v11  ;;  %p1993_p8 = pnand %p1992_p10, %p1986_p3 }
  0x8c   : > { %576 = vmatpush1.bf16.msra.mxu0 %v1744_v12  ;;  %1648 = vmatpush1.bf16.msra.mxu1 %v1744_v12 }
  0x8d   : > { %577 = vmatprep.subr.bf16.mxu0 %v1745_v13  ;;  %1641 = vmatprep.subr.bf16.mxu1 %v1745_v13  ;;  %v1113_v13 = vunpack.c.h.bf16 %v2416_v56 }
  0x90   : > { %578 = vmatpush1.bf16.msra.mxu0 %v1747_v14  ;;  %1649 = vmatpush1.bf16.msra.mxu1 %v1747_v14  ;;  %v2503_v14 = vld [vmem:[%s2375_s6 + $0x78] sm:$0xff] }
  0x91   : > { %579 = vmatprep.subr.bf16.mxu0 %v1748_v15  ;;  %1642 = vmatprep.subr.bf16.mxu1 %v1748_v15 }
  0x94   : > { %580 = vmatpush1.bf16.msra.mxu0 %v1750_v16  ;;  %1650 = vmatpush1.bf16.msra.mxu1 %v1750_v16 }
  0x97   : > { %598 = vmatmul.mubr.bf16.vlgmr.msra.gmra.mrb[0].mxu0 %v1751_v17  ;;  %678 = vmatmul.mubr.bf16.vlgmr.msra.gmra.mrb[0].mxu1 %v1755_v18 }
  0x98   : > { %607 = vmatprep.mubr.bf16.mxu0 %v2095_v0  ;;  %687 = vmatprep.mubr.bf16.mxu1 %v2095_v0 }
  0x9f   : > { %608 = vmatmul.mubr.bf16.gmra.mrb[4].mxu0 %v1752_v19  ;;  %688 = vmatmul.mubr.bf16.gmra.mrb[4].mxu1 %v1757_v20  ;;  %v1114_v20 = vunpack.c.l.bf16 %v2433_v3 }
  0xa0   : > { %617 = vmatprep.mubr.bf16.mxu0 %v2095_v0  ;;  %697 = vmatprep.mubr.bf16.mxu1 %v2095_v0 }
  0xa7   : > { %618 = vmatmul.mubr.bf16.gmra.mrb[8].mxu0 %v1753_v21  ;;  %698 = vmatmul.mubr.bf16.gmra.mrb[8].mxu1 %v1759_v22  ;;  %v1115_v21 = vunpack.c.h.bf16 %v2433_v3  ;;  %v2454_v22 = vld [vmem:[%s2375_s6 + $0x58] sm:$0xff] }
  0xa8   : > { %627 = vmatprep.mubr.bf16.mxu0 %v2095_v0  ;;  %707 = vmatprep.mubr.bf16.mxu1 %v2095_v0 }
  0xaf   : > { %628 = vmatmul.mubr.bf16.gmra.mrb[12].mxu0 %v1754_v23  ;;  %708 = vmatmul.mubr.bf16.gmra.mrb[12].mxu1 %v1761_v24 }
  0xb0   : > { %637 = vmatprep.mubr.bf16.mxu0 %v2095_v0  ;;  %717 = vmatprep.mubr.bf16.mxu1 %v2095_v0 }
  0xb7   : > { %638 = vmatmul.mubr.bf16.gmra.mrb[16].mxu0 %v1756_v25  ;;  %718 = vmatmul.mubr.bf16.gmra.mrb[16].mxu1 %v1763_v26 }
  0xb8   : > { %647 = vmatprep.mubr.bf16.mxu0 %v2095_v0  ;;  %727 = vmatprep.mubr.bf16.mxu1 %v2095_v0 }
  0xbf   : > { %648 = vmatmul.mubr.bf16.gmra.mrb[20].mxu0 %v1758_v27  ;;  %728 = vmatmul.mubr.bf16.gmra.mrb[20].mxu1 %v1764_v28  ;;  %v2482_v27 = vld [vmem:[%s2375_s6 + $0xb0] sm:$0xff] }
  0xc0   : > { %657 = vmatprep.mubr.bf16.mxu0 %v2095_v0  ;;  %737 = vmatprep.mubr.bf16.mxu1 %v2095_v0 }
  0xc7   : > { %658 = vmatmul.mubr.bf16.gmra.mrb[24].mxu0 %v1760_v29  ;;  %738 = vmatmul.mubr.bf16.gmra.mrb[24].mxu1 %v1765_v30  ;;  %v2461_v29 = vld [vmem:[%s2375_s6 + $0xa0] sm:$0xff] }
  0xc8   : > { %667 = vmatprep.mubr.bf16.mxu0 %v2095_v0  ;;  %747 = vmatprep.mubr.bf16.mxu1 %v2095_v0 }
  0xcf   : > { %668 = vmatmul.mubr.bf16.gmra.mrb[28].mxu0 %v1762_v31  ;;  %748 = vmatmul.mubr.bf16.gmra.mrb[28].mxu1 %v1766_v32 }
 0x16a   : > { %v599_v10 = vpop.f32.mrb[0].mxu0  ;;  %v679_v11 = vpop.f32.mrb[0].mxu1 }
 0x16b   : > { %v600_v16 = vadd.f32 %v599_v10, %v2389_v42  ;;  %v601_v17 = vpop.f32.mrb[1].mxu0  ;;  %v681_v18 = vpop.f32.mrb[1].mxu1  ;;  %v680_v32 = vadd.f32 %v679_v11, %v2389_v42  ;;  %v2488_v10 = vld [vmem:[%s2375_s6 + $0xb8] sm:$0xff] }
 0x16c   : > { %v602_v23 = vadd.f32 %v601_v17, %v2398_v46  ;;  %v603_v24 = vpop.f32.mrb[2].mxu0  ;;  %v683_v25 = vpop.f32.mrb[2].mxu1  ;;  %v682_v37 = vadd.f32 %v681_v18, %v2398_v46 }
 0x16d   : > { %1767 = vtanh.f32 %v600_v16  ;;  %v604_v30 = vadd.f32 %v603_v24, %v2389_v42  ;;  %v605_v31 = vpop.f32.mrb[3].mxu0  ;;  %v685_v33 = vpop.f32.mrb[3].mxu1  ;;  %v2473_v16 = vld [vmem:[%s2375_s6 + $0x60] sm:$0xff]  ;;  %v684_v17 = vadd.f32 %v683_v25, %v2389_v42  ;;  %v2494_v24 = vld [vmem:[%s2375_s6 + $0x70] sm:$0xff] }
 0x16e   : > { %1769 = vtanh.f32 %v602_v23  ;;  %v606_v36 = vadd.f32 %v605_v31, %v2398_v46  ;;  %v686_v23 = vadd.f32 %v685_v33, %v2398_v46 }
 0x16f   : > { %1771 = vtanh.f32 %v604_v30 }
 0x170   : > { %1773 = vtanh.f32 %v606_v36 }
 0x171   : > { %1775 = vtanh.f32 %v680_v32 }
 0x172   : > { %v609_v19 = vpop.f32.mrb[4].mxu0  ;;  %1777 = vtanh.f32 %v682_v37  ;;  %v689_v36 = vpop.f32.mrb[4].mxu1 }
 0x173   : > { %v610_v32 = vadd.f32 %v609_v19, %v2389_v42  ;;  %v611_v25 = vpop.f32.mrb[5].mxu0  ;;  %1779 = vtanh.f32 %v684_v17  ;;  %v691_v15 = vpop.f32.mrb[5].mxu1  ;;  %v2509_v19 = vld [vmem:[%s2375_s6 + $0xc0] sm:$0xff]  ;;  %v690_v28 = vadd.f32 %v689_v36, %v2389_v42 }
 0x174   : > { %v612_v37 = vadd.f32 %v611_v25, %v2398_v46  ;;  %v613_v33 = vpop.f32.mrb[6].mxu0  ;;  %1781 = vtanh.f32 %v686_v23  ;;  %v693_v12 = vpop.f32.mrb[6].mxu1  ;;  %v692_v25 = vadd.f32 %v691_v15, %v2398_v46 }
 0x175   : > { %1783 = vtanh.f32 %v610_v32  ;;  %v614_v17 = vadd.f32 %v613_v33, %v2389_v42  ;;  %v615_v30 = vpop.f32.mrb[7].mxu0  ;;  %v695_v11 = vpop.f32.mrb[7].mxu1 }
 0x176   : > { %1785 = vtanh.f32 %v612_v37  ;;  %v616_v23 = vadd.f32 %v615_v30, %v2398_v46  ;;  %v694_v30 = vadd.f32 %v693_v12, %v2389_v42 }
 0x177   : > { %v1768_v31 = vpop.eup %1767  ;;  %1787 = vtanh.f32 %v614_v17 }
 0x178   : > { %v1770_v1 = vpop.eup %1769  ;;  %v1142_v4 = vsub.f32 %v1768_v31, %v1078_v45  ;;  %1789 = vtanh.f32 %v616_v23  ;;  %v2533_v23 = vadd.f32 %v695_v11, %v2398_v46 }
 0x179   : > { %v1772_v37 = vpop.eup %1771  ;;  %v1602_v18 = vpack.c.bf16 %v1770_v1, %v1768_v31  ;;  %v1143_v17 = vsub.f32 %v1770_v1, %v1079_v47  ;;  %1791 = vtanh.f32 %v690_v28 }
 0x17a   : > { %v1774_v32 = vpop.eup %1773  ;;  %v1206_v36 = vmul.f32 %v1142_v4, %v1142_v4  ;;  %v1144_v0 = vsub.f32 %v1772_v37, %v1080_v48  ;;  %v619_v45 = vpop.f32.mrb[8].mxu0  ;;  %1793 = vtanh.f32 %v692_v25 }
 0x17b   : > { %v2535_v12 = vpop.f32.mrb[8].mxu1  ;;  %v1776_v15 = vpop.eup %1775  ;;  %1014 = vst [vmem:[%s2539_s8] sm:$0xff] %v1602_v18  ;;  %v1207_v38 = vmul.f32 %v1143_v17, %v1143_v17  ;;  %v1603_v47 = vpack.c.bf16 %v1774_v32, %v1772_v37  ;;  %v1145_v1 = vsub.f32 %v1774_v32, %v1081_v51  ;;  %v620_v48 = vadd.f32 %v619_v45, %v2389_v42 }
 0x17c   : > { %v621_v4 = vpop.f32.mrb[9].mxu0  ;;  %v2545_v28 = vpop.f32.mrb[9].mxu1  ;;  %v1208_v31 = vmul.f32 %v1144_v0, %v1144_v0  ;;  %v1174_v63 = vsub.f32 %v1776_v15, %v1110_v5  ;;  %1795 = vtanh.f32 %v694_v30 }
 0x17d   : > { %v1778_v11 = vpop.eup %1777  ;;  %v622_v25 = vadd.f32 %v621_v4, %v2398_v46  ;;  %v623_v33 = vpop.f32.mrb[10].mxu0  ;;  %v1270_v17 = vadd.f32 %v1207_v38, %v1206_v36  ;;  %1015 = vst [vmem:[%s2539_s8 + $0x8] sm:$0xff] %v1603_v47  ;;  %v1209_v39 = vmul.f32 %v1145_v1, %v1145_v1  ;;  %1797 = vtanh.f32 %v620_v48 }
 0x17e   : > { %v2550_v18 = vpop.f32.mrb[10].mxu1  ;;  %v1780_v37 = vpop.eup %1779  ;;  %v624_v51 = vadd.f32 %v623_v33, %v2389_v42  ;;  %v1238_v26 = vmul.f32 %v1174_v63, %v1174_v63  ;;  %v1618_v5 = vpack.c.bf16 %v1778_v11, %v1776_v15  ;;  %v1175_v36 = vsub.f32 %v1778_v11, %v1111_v6 }
 0x17f   : > { %v625_v32 = vpop.f32.mrb[11].mxu0  ;;  %v2554_v45 = vpop.f32.mrb[11].mxu1  ;;  %1799 = vtanh.f32 %v622_v25  ;;  %v1271_v60 = vadd.f32 %v1209_v39, %v1208_v31  ;;  %v1176_v38 = vsub.f32 %v1780_v37, %v1112_v7 }
 0x180   : > { %v1782_v0 = vpop.eup %1781  ;;  %v626_v4 = vadd.f32 %v625_v32, %v2398_v46  ;;  %1801 = vtanh.f32 %v624_v51  ;;  %1030 = vst [vmem:[%s2539_s8 + $0x80] sm:$0xff] %v1618_v5  ;;  %v1239_v6 = vmul.f32 %v1175_v36, %v1175_v36 }
 0x181   : > { %v1784_v30 = vpop.eup %1783  ;;  %v1619_v1 = vpack.c.bf16 %v1782_v0, %v1780_v37  ;;  %v1177_v63 = vsub.f32 %v1782_v0, %v1113_v13  ;;  %v1302_v48 = vadd.f32 %v1271_v60, %v1270_v17  ;;  %v1240_v39 = vmul.f32 %v1176_v38, %v1176_v38 }
 0x182   : > { %v1786_v33 = vpop.eup %1785  ;;  %v1146_v47 = vsub.f32 %v1784_v30, %v1082_v52  ;;  %1803 = vtanh.f32 %v626_v4  ;;  %v629_v52 = vpop.f32.mrb[12].mxu0 }
 0x183   : > { %v1788_v15 = vpop.eup %1787  ;;  %v1604_v31 = vpack.c.bf16 %v1786_v33, %v1784_v30  ;;  %v1147_v55 = vsub.f32 %v1786_v33, %v1083_v53  ;;  %1031 = vst [vmem:[%s2539_s8 + $0x88] sm:$0xff] %v1619_v1  ;;  %v1241_v37 = vmul.f32 %v1177_v63, %v1177_v63  ;;  %v2571_v51 = vpop.f32.mrb[12].mxu1  ;;  %v630_v53 = vadd.f32 %v629_v52, %v2389_v42  ;;  %v2591_v63 = vld [vmem:[%s2375_s6 + $0xd0] sm:$0xff] }
 0x184   : > { %v1790_v7 = vpop.eup %1789  ;;  %v1210_v11 = vmul.f32 %v1146_v47, %v1146_v47  ;;  %v1148_v25 = vsub.f32 %v1788_v15, %v1084_v54  ;;  %v631_v17 = vpop.f32.mrb[13].mxu0  ;;  %v2580_v30 = vadd.f32 %v1239_v6, %v1238_v26 }
 0x185   : > { %v1792_v56 = vpop.eup %1791  ;;  %1016 = vst [vmem:[%s2539_s8 + $0x10] sm:$0xff] %v1604_v31  ;;  %v1211_v60 = vmul.f32 %v1147_v55, %v1147_v55  ;;  %v1605_v13 = vpack.c.bf16 %v1790_v7, %v1788_v15  ;;  %v1149_v40 = vsub.f32 %v1790_v7, %v1085_v57  ;;  %v2577_v32 = vpop.f32.mrb[13].mxu1  ;;  %v632_v4 = vadd.f32 %v631_v17, %v2398_v46 }
 0x186   : > { %v1794_v54 = vpop.eup %1793  ;;  %v1212_v0 = vmul.f32 %v1148_v25, %v1148_v25  ;;  %v633_v5 = vpop.f32.mrb[14].mxu0  ;;  %v2582_v36 = vadd.f32 %v1241_v37, %v1240_v39  ;;  %1805 = vtanh.f32 %v630_v53  ;;  %v1178_v31 = vsub.f32 %v1792_v56, %v1114_v20 }
 0x187   : > { %v2584_v38 = vpop.f32.mrb[14].mxu1  ;;  %v1272_v33 = vadd.f32 %v1211_v60, %v1210_v11  ;;  %1017 = vst [vmem:[%s2539_s8 + $0x18] sm:$0xff] %v1605_v13  ;;  %v1213_v41 = vmul.f32 %v1149_v40, %v1149_v40  ;;  %v634_v57 = vadd.f32 %v633_v5, %v2389_v42  ;;  %v635_v47 = vpop.f32.mrb[15].mxu0  ;;  %1807 = vtanh.f32 %v632_v4 }
 0x188   : > { %v2588_v1 = vpop.f32.mrb[15].mxu1  ;;  %v2593_v15 = vpop.eup %1795  ;;  %v636_v26 = vadd.f32 %v635_v47, %v2398_v46  ;;  %v1620_v55 = vpack.c.bf16 %v1794_v54, %v1792_v56  ;;  %v1179_v25 = vsub.f32 %v1794_v54, %v1115_v21  ;;  %v1242_v37 = vmul.f32 %v1178_v31, %v1178_v31 }
 0x189   : > { %v1798_v6 = vpop.eup %1797  ;;  %v1303_v7 = vadd.f32 %v1302_v48, %v1272_v33  ;;  %v1273_v11 = vadd.f32 %v1213_v41, %v1212_v0  ;;  %1809 = vtanh.f32 %v634_v57  ;;  %v1130_v60 = vunpack.c.l.bf16 %v2591_v63 }
 0x18a   : > { %v1800_v52 = vpop.eup %1799  ;;  %v1150_v39 = vsub.f32 %v1798_v6, %v1086_v58  ;;  %1811 = vtanh.f32 %v636_v26  ;;  %1032 = vst [vmem:[%s2539_s8 + $0x90] sm:$0xff] %v1620_v55  ;;  %v1243_v40 = vmul.f32 %v1179_v25, %v1179_v25  ;;  %v2969_v21 = vunpack.c.l.bf16 %v2395_v44  ;;  %v639_v54 = vpop.f32.mrb[16].mxu0 }
 0x18b   : > { %v1802_v13 = vpop.eup %1801  ;;  %v1304_v20 = vadd.f32 %v1303_v7, %v1273_v11  ;;  %v1606_v56 = vpack.c.bf16 %v1800_v52, %v1798_v6  ;;  %v1151_v48 = vsub.f32 %v1800_v52, %v1087_v59  ;;  %v2970_v58 = vunpack.c.l.bf16 %v2440_v8  ;;  %v2612_v4 = vpop.f32.mrb[16].mxu1  ;;  %v2628_v11 = vld [vmem:[%s2375_s6 + $0xd8] sm:$0xff] }
 0x18c   : > { %v1804_v53 = vpop.eup %1803  ;;  %v1214_v3 = vmul.f32 %v1150_v39, %v1150_v39  ;;  %v1152_v17 = vsub.f32 %v1802_v13, %v2969_v21  ;;  %1813 = vtanh.f32 %v2533_v23  ;;  %v2971_v5 = vunpack.c.h.bf16 %v2395_v44  ;;  %v641_v57 = vpop.f32.mrb[17].mxu0 }
 0x18d   : > { %v1180_v0 = vsub.f32 %v2593_v15, %v2970_v58  ;;  %1018 = vst [vmem:[%s2539_s8 + $0x20] sm:$0xff] %v1606_v56  ;;  %v1215_v43 = vmul.f32 %v1151_v48, %v1151_v48  ;;  %v1607_v59 = vpack.c.bf16 %v1804_v53, %v1802_v13  ;;  %v640_v41 = vadd.f32 %v639_v54, %v2389_v42  ;;  %v2618_v47 = vpop.f32.mrb[17].mxu1  ;;  %v643_v55 = vpop.f32.mrb[18].mxu0 }
 0x18e   : > { %v1153_v33 = vsub.f32 %v1804_v53, %v2971_v5  ;;  %v1216_v26 = vmul.f32 %v1152_v17, %v1152_v17  ;;  %v642_v31 = vadd.f32 %v641_v57, %v2398_v46  ;;  %v2621_v6 = vadd.f32 %v1243_v40, %v1242_v37  ;;  %v2625_v7 = vpop.f32.mrb[18].mxu1  ;;  %v645_v39 = vpop.f32.mrb[19].mxu0 }
 0x18f   : > { %v700_v23 = vadd.f32 %v2535_v12, %v2389_v42  ;;  %v1274_v44 = vadd.f32 %v1215_v43, %v1214_v3  ;;  %1019 = vst [vmem:[%s2539_s8 + $0x28] sm:$0xff] %v1607_v59  ;;  %1815 = vtanh.f32 %v640_v41  ;;  %v644_v52 = vadd.f32 %v643_v55, %v2389_v42  ;;  %v2632_v13 = vpop.f32.mrb[19].mxu1 }
 0x190   : > { %v1217_v25 = vmul.f32 %v1153_v33, %v1153_v33  ;;  %1817 = vtanh.f32 %v642_v31  ;;  %v646_v37 = vadd.f32 %v645_v39, %v2398_v46  ;;  %v702_v56 = vadd.f32 %v2545_v28, %v2398_v46  ;;  %v1806_v48 = vpop.eup %1805 }
 0x191   : > { %v1131_v12 = vunpack.c.h.bf16 %v2591_v63  ;;  %v1305_v40 = vadd.f32 %v1304_v20, %v1274_v44  ;;  %1819 = vtanh.f32 %v644_v52  ;;  %v1132_v3 = vunpack.c.l.bf16 %v2628_v11  ;;  %v1808_v21 = vpop.eup %1807 }
 0x192   : > { %v1275_v53 = vadd.f32 %v1217_v25, %v1216_v26  ;;  %v2972_v17 = vunpack.c.l.bf16 %v2403_v49  ;;  %1821 = vtanh.f32 %v646_v37  ;;  %v1244_v58 = vmul.f32 %v1180_v0, %v1180_v0  ;;  %v649_v55 = vpop.f32.mrb[20].mxu0  ;;  %v2649_v44 = vpop.f32.mrb[20].mxu1 }
 0x193   : > { %v704_v43 = vadd.f32 %v2550_v18, %v2389_v42  ;;  %v1810_v59 = vpop.eup %1809  ;;  %v1608_v5 = vpack.c.bf16 %v1808_v21, %v1806_v48  ;;  %v2973_v33 = vunpack.c.h.bf16 %v2403_v49  ;;  %1823 = vtanh.f32 %v700_v23  ;;  %v651_v39 = vpop.f32.mrb[21].mxu0 }
 0x194   : > { %v1154_v54 = vsub.f32 %v1806_v48, %v2972_v17  ;;  %v1306_v28 = vadd.f32 %v1305_v40, %v1275_v53  ;;  %v1812_v41 = vpop.eup %1811  ;;  %v2974_v26 = vunpack.c.l.bf16 %v2406_v50  ;;  %1825 = vtanh.f32 %v702_v56  ;;  %v2655_v37 = vpop.f32.mrb[21].mxu1 }
 0x195   : > { %v1155_v20 = vsub.f32 %v1808_v21, %v2973_v33  ;;  %v706_v0 = vadd.f32 %v2554_v45, %v2398_v46  ;;  %1020 = vst [vmem:[%s2539_s8 + $0x30] sm:$0xff] %v1608_v5  ;;  %v1609_v25 = vpack.c.bf16 %v1812_v41, %v1810_v59  ;;  %v2975_v49 = vunpack.c.h.bf16 %v2406_v50  ;;  %v653_v53 = vpop.f32.mrb[22].mxu0  ;;  %v2660_v21 = vpop.f32.mrb[22].mxu1 }
 0x196   : > { %v1218_v57 = vmul.f32 %v1154_v54, %v1154_v54  ;;  %v1156_v31 = vsub.f32 %v1810_v59, %v2974_v26  ;;  %v650_v23 = vadd.f32 %v649_v55, %v2389_v42  ;;  %v1814_v48 = vpop.eup %1813  ;;  %v652_v56 = vadd.f32 %v651_v39, %v2398_v46  ;;  %v655_v59 = vpop.f32.mrb[23].mxu0 }
 0x197   : > { %v1219_v18 = vmul.f32 %v1155_v20, %v1155_v20  ;;  %v1157_v52 = vsub.f32 %v1812_v41, %v2975_v49  ;;  %1827 = vtanh.f32 %v704_v43  ;;  %v710_v45 = vadd.f32 %v2571_v51, %v2389_v42  ;;  %1021 = vst [vmem:[%s2539_s8 + $0x38] sm:$0xff] %v1609_v25  ;;  %v2664_v5 = vpop.f32.mrb[23].mxu1 }
 0x198   : > { %v1220_v40 = vmul.f32 %v1156_v31, %v1156_v31  ;;  %1829 = vtanh.f32 %v650_v23  ;;  %v1621_v54 = vpack.c.bf16 %v1814_v48, %v2593_v15  ;;  %v2976_v33 = vunpack.c.h.bf16 %v2440_v8 }
 0x199   : > { %v1276_v17 = vadd.f32 %v1219_v18, %v1218_v57  ;;  %v1221_v50 = vmul.f32 %v1157_v52, %v1157_v52  ;;  %1831 = vtanh.f32 %v652_v56  ;;  %v654_v43 = vadd.f32 %v653_v53, %v2389_v42  ;;  %v1816_v41 = vpop.eup %1815 }
 0x19a   : > { %v1181_v20 = vsub.f32 %v1814_v48, %v2976_v33  ;;  %v656_v51 = vadd.f32 %v655_v59, %v2398_v46  ;;  %1033 = vst [vmem:[%s2539_s8 + $0x98] sm:$0xff] %v1621_v54  ;;  %1833 = vtanh.f32 %v706_v0  ;;  %v1133_v57 = vunpack.c.h.bf16 %v2628_v11  ;;  %v1818_v55 = vpop.eup %1817 }
 0x19b   : > { %v1307_v26 = vadd.f32 %v1306_v28, %v1276_v17  ;;  %v1277_v31 = vadd.f32 %v1221_v50, %v1220_v40  ;;  %v2977_v15 = vunpack.c.l.bf16 %v2423_v61  ;;  %1835 = vtanh.f32 %v654_v43  ;;  %v1820_v49 = vpop.eup %1819  ;;  %v659_v17 = vpop.f32.mrb[24].mxu0 }
 0x19c   : > { %v1245_v25 = vmul.f32 %v1181_v20, %v1181_v20  ;;  %v712_v8 = vadd.f32 %v2577_v32, %v2398_v46  ;;  %v1610_v23 = vpack.c.bf16 %v1818_v55, %v1816_v41  ;;  %v2978_v28 = vunpack.c.h.bf16 %v2423_v61  ;;  %v1822_v0 = vpop.eup %1821  ;;  %v2682_v50 = vpop.f32.mrb[24].mxu1 }
 0x19d   : > { %v1158_v18 = vsub.f32 %v1816_v41, %v2977_v15  ;;  %v1308_v52 = vadd.f32 %v1307_v26, %v1277_v31  ;;  %1837 = vtanh.f32 %v656_v51  ;;  %v2979_v40 = vunpack.c.l.bf16 %v2426_v62  ;;  %v1824_v54 = vpop.eup %1823  ;;  %v661_v43 = vpop.f32.mrb[25].mxu0 }
 0x19e   : > { %v1159_v39 = vsub.f32 %v1818_v55, %v2978_v28  ;;  %v2680_v53 = vadd.f32 %v1245_v25, %v1244_v58  ;;  %1839 = vtanh.f32 %v710_v45  ;;  %1022 = vst [vmem:[%s2539_s8 + $0x40] sm:$0xff] %v1610_v23  ;;  %v1611_v59 = vpack.c.bf16 %v1822_v0, %v1820_v49  ;;  %v2688_v51 = vpop.f32.mrb[25].mxu1  ;;  %v1826_v41 = vpop.eup %1825 }
 0x19f   : > { %v1222_v48 = vmul.f32 %v1158_v18, %v1158_v18  ;;  %v1160_v56 = vsub.f32 %v1820_v49, %v2979_v40  ;;  %v2980_v61 = vunpack.c.h.bf16 %v2426_v62  ;;  %v660_v20 = vadd.f32 %v659_v17, %v2389_v42  ;;  %v663_v55 = vpop.f32.mrb[26].mxu0  ;;  %v2693_v15 = vpop.f32.mrb[26].mxu1 }
 0x1a0   : > { %v1223_v32 = vmul.f32 %v1159_v39, %v1159_v39  ;;  %v2981_v26 = vunpack.c.l.bf16 %v2461_v29  ;;  %v662_v31 = vadd.f32 %v661_v43, %v2398_v46  ;;  %1841 = vtanh.f32 %v712_v8  ;;  %1023 = vst [vmem:[%s2539_s8 + $0x48] sm:$0xff] %v1611_v59  ;;  %v665_v28 = vpop.f32.mrb[27].mxu0  ;;  %v2698_v39 = vpop.f32.mrb[27].mxu1 }
 0x1a1   : > { %v1161_v33 = vsub.f32 %v1822_v0, %v2980_v61  ;;  %v1224_v58 = vmul.f32 %v1160_v56, %v1160_v56  ;;  %v1622_v25 = vpack.c.bf16 %v1826_v41, %v1824_v54  ;;  %v2982_v49 = vunpack.c.h.bf16 %v2461_v29  ;;  %v1828_v0 = vpop.eup %1827 }
 0x1a2   : > { %v1182_v45 = vsub.f32 %v1824_v54, %v2981_v26  ;;  %v1278_v18 = vadd.f32 %v1223_v32, %v1222_v48  ;;  %1843 = vtanh.f32 %v660_v20  ;;  %v664_v56 = vadd.f32 %v663_v55, %v2389_v42  ;;  %v1830_v17 = vpop.eup %1829 }
 0x1a3   : > { %v1225_v62 = vmul.f32 %v1161_v33, %v1161_v33  ;;  %v1183_v23 = vsub.f32 %v1826_v41, %v2982_v49  ;;  %v714_v8 = vadd.f32 %v2584_v38, %v2389_v42  ;;  %1034 = vst [vmem:[%s2539_s8 + $0xa0] sm:$0xff] %v1622_v25  ;;  %v2983_v54 = vunpack.c.l.bf16 %v2467_v35  ;;  %v1832_v59 = vpop.eup %1831 }
 0x1a4   : > { %v1246_v40 = vmul.f32 %v1182_v45, %v1182_v45  ;;  %v1309_v61 = vadd.f32 %v1308_v52, %v1278_v18  ;;  %v2984_v33 = vunpack.c.l.bf16 %v2443_v9  ;;  %1845 = vtanh.f32 %v662_v31  ;;  %v1834_v38 = vpop.eup %1833 }
 0x1a5   : > { %v1279_v48 = vadd.f32 %v1225_v62, %v1224_v58  ;;  %v1247_v32 = vmul.f32 %v1183_v23, %v1183_v23  ;;  %v1184_v29 = vsub.f32 %v1828_v0, %v2983_v54  ;;  %v666_v20 = vadd.f32 %v665_v28, %v2398_v46  ;;  %v1836_v18 = vpop.eup %1835  ;;  %v669_v28 = vpop.f32.mrb[28].mxu0 }
 0x1a6   : > { %v1162_v43 = vsub.f32 %v1830_v17, %v2984_v33  ;;  %v716_v41 = vadd.f32 %v2588_v1, %v2398_v46  ;;  %v1612_v52 = vpack.c.bf16 %v1832_v59, %v1830_v17  ;;  %v2985_v58 = vunpack.c.h.bf16 %v2443_v9  ;;  %v2717_v54 = vpop.f32.mrb[28].mxu1 }
 0x1a7   : > { %v1310_v26 = vadd.f32 %v1309_v61, %v1279_v48  ;;  %v2713_v55 = vadd.f32 %v1247_v32, %v1246_v40  ;;  %v1248_v25 = vmul.f32 %v1184_v29, %v1184_v29  ;;  %v1623_v49 = vpack.c.bf16 %v1834_v38, %v1828_v0  ;;  %v1838_v1 = vpop.eup %1837  ;;  %v671_v48 = vpop.f32.mrb[29].mxu0 }
 0x1a8   : > { %v1163_v45 = vsub.f32 %v1832_v59, %v2985_v58  ;;  %v1226_v62 = vmul.f32 %v1162_v43, %v1162_v43  ;;  %v2986_v31 = vunpack.c.h.bf16 %v2467_v35  ;;  %1024 = vst [vmem:[%s2539_s8 + $0x50] sm:$0xff] %v1612_v52  ;;  %v2987_v17 = vunpack.c.l.bf16 %v2454_v22  ;;  %v2723_v32 = vpop.f32.mrb[29].mxu1  ;;  %v1840_v0 = vpop.eup %1839 }
 0x1a9   : > { %1847 = vtanh.f32 %v664_v56  ;;  %v670_v40 = vadd.f32 %v669_v28, %v2389_v42  ;;  %v1613_v29 = vpack.c.bf16 %v1838_v1, %v1836_v18  ;;  %v2988_v35 = vunpack.c.h.bf16 %v2454_v22  ;;  %1035 = vst [vmem:[%s2539_s8 + $0xa8] sm:$0xff] %v1623_v49  ;;  %v673_v43 = vpop.f32.mrb[30].mxu0 }
 0x1aa   : > { %v1185_v23 = vsub.f32 %v1834_v38, %v2986_v31  ;;  %v1227_v61 = vmul.f32 %v1163_v45, %v1163_v45  ;;  %v1164_v9 = vsub.f32 %v1836_v18, %v2987_v17  ;;  %1849 = vtanh.f32 %v666_v20  ;;  %v2728_v38 = vpop.f32.mrb[30].mxu1  ;;  %v675_v31 = vpop.f32.mrb[31].mxu0 }
 0x1ab   : > { %v1165_v59 = vsub.f32 %v1838_v1, %v2988_v35  ;;  %v2989_v56 = vunpack.c.l.bf16 %v2482_v27  ;;  %1851 = vtanh.f32 %v714_v8  ;;  %v2732_v28 = vpop.f32.mrb[31].mxu1  ;;  %v1842_v17 = vpop.eup %1841  ;;  %1025 = vst [vmem:[%s2539_s8 + $0x58] sm:$0xff] %v1613_v29  ;;  %v672_v20 = vadd.f32 %v671_v48, %v2398_v46  ;;  %v2748_v48 = vld [vmem:[%s2375_s6 + $0xe0] sm:$0xff] }
 0x1ac   : > { %v1249_v33 = vmul.f32 %v1185_v23, %v1185_v23  ;;  %v1280_v52 = vadd.f32 %v1227_v61, %v1226_v62  ;;  %v1228_v58 = vmul.f32 %v1164_v9, %v1164_v9  ;;  %1853 = vtanh.f32 %v670_v40  ;;  %v1844_v8 = vpop.eup %1843 }
 0x1ad   : > { %v1186_v45 = vsub.f32 %v1840_v0, %v2989_v56  ;;  %v1229_v22 = vmul.f32 %v1165_v59, %v1165_v59  ;;  %v1624_v23 = vpack.c.bf16 %v1842_v17, %v1840_v0  ;;  %v2990_v1 = vunpack.c.h.bf16 %v2482_v27 }
 0x1ae   : > { %v2735_v18 = vadd.f32 %v1249_v33, %v1248_v25  ;;  %v1311_v49 = vadd.f32 %v1310_v26, %v1280_v52  ;;  %1855 = vtanh.f32 %v716_v41  ;;  %v674_v35 = vadd.f32 %v673_v43, %v2389_v42  ;;  %v1846_v27 = vpop.eup %1845 }
 0x1af   : > { %v1250_v62 = vmul.f32 %v1186_v45, %v1186_v45  ;;  %v1187_v61 = vsub.f32 %v1842_v17, %v2990_v1  ;;  %v1281_v9 = vadd.f32 %v1229_v22, %v1228_v58  ;;  %v676_v29 = vadd.f32 %v675_v31, %v2398_v46  ;;  %1036 = vst [vmem:[%s2539_s8 + $0xb0] sm:$0xff] %v1624_v23 }
 0x1b0   : > { %v2991_v25 = vunpack.c.l.bf16 %v2473_v16  ;;  %1857 = vtanh.f32 %v672_v20  ;;  %v720_v26 = vadd.f32 %v2612_v4, %v2389_v42  ;;  %v722_v41 = vadd.f32 %v2618_v47, %v2398_v46 }
 0x1b1   : > { %v1251_v40 = vmul.f32 %v1187_v61, %v1187_v61  ;;  %v1312_v0 = vadd.f32 %v1311_v49, %v1281_v9  ;;  %1859 = vtanh.f32 %v674_v35  ;;  %v724_v33 = vadd.f32 %v2625_v7, %v2389_v42 }
 0x1b2   : > { %v1166_v59 = vsub.f32 %v1844_v8, %v2991_v25  ;;  %v1614_v52 = vpack.c.bf16 %v1846_v27, %v1844_v8  ;;  %v2992_v58 = vunpack.c.h.bf16 %v2473_v16  ;;  %1861 = vtanh.f32 %v676_v29 }
 0x1b3   : > { %v2756_v45 = vadd.f32 %v1251_v40, %v1250_v62  ;;  %v726_v4 = vadd.f32 %v2632_v13, %v2398_v46  ;;  %v1134_v31 = vunpack.c.l.bf16 %v2748_v48  ;;  %v1135_v17 = vunpack.c.h.bf16 %v2748_v48  ;;  %v1848_v22 = vpop.eup %1847 }
 0x1b4   : > { %v1230_v43 = vmul.f32 %v1166_v59, %v1166_v59  ;;  %v1167_v56 = vsub.f32 %v1846_v27, %v2992_v58  ;;  %1026 = vst [vmem:[%s2539_s8 + $0x60] sm:$0xff] %v1614_v52  ;;  %1863 = vtanh.f32 %v720_v26  ;;  %v730_v7 = vadd.f32 %v2649_v44, %v2389_v42  ;;  %v1850_v20 = vpop.eup %1849 }
 0x1b5   : > { %v732_v16 = vadd.f32 %v2655_v37, %v2398_v46  ;;  %v2993_v49 = vunpack.c.l.bf16 %v2479_v34  ;;  %1865 = vtanh.f32 %v722_v41  ;;  %v734_v13 = vadd.f32 %v2660_v21, %v2389_v42  ;;  %v1852_v1 = vpop.eup %1851 }
 0x1b6   : > { %v1231_v47 = vmul.f32 %v1167_v56, %v1167_v56  ;;  %v736_v23 = vadd.f32 %v2664_v5, %v2398_v46  ;;  %v1615_v8 = vpack.c.bf16 %v1850_v20, %v1848_v22  ;;  %v2994_v44 = vunpack.c.h.bf16 %v2479_v34  ;;  %v1854_v37 = vpop.eup %1853 }
 0x1b7   : > { %v1168_v62 = vsub.f32 %v1848_v22, %v2993_v49  ;;  %1867 = vtanh.f32 %v724_v33  ;;  %v2995_v29 = vunpack.c.l.bf16 %v2488_v10  ;;  %v740_v59 = vadd.f32 %v2682_v50, %v2389_v42 }
 0x1b8   : > { %v1282_v61 = vadd.f32 %v1231_v47, %v1230_v43  ;;  %v1169_v9 = vsub.f32 %v1850_v20, %v2994_v44  ;;  %1869 = vtanh.f32 %v726_v4  ;;  %1027 = vst [vmem:[%s2539_s8 + $0x68] sm:$0xff] %v1615_v8  ;;  %v2996_v5 = vunpack.c.l.bf16 %v2494_v24  ;;  %v1856_v27 = vpop.eup %1855 }
 0x1b9   : > { %v1232_v35 = vmul.f32 %v1168_v62, %v1168_v62  ;;  %v1188_v25 = vsub.f32 %v1852_v1, %v2995_v29  ;;  %1871 = vtanh.f32 %v730_v7  ;;  %v742_v34 = vadd.f32 %v2688_v51, %v2398_v46 }
 0x1ba   : > { %v1313_v21 = vadd.f32 %v1312_v0, %v1282_v61  ;;  %v1233_v40 = vmul.f32 %v1169_v9, %v1169_v9  ;;  %v1170_v26 = vsub.f32 %v1854_v37, %v2996_v5  ;;  %1873 = vtanh.f32 %v732_v16  ;;  %v1858_v50 = vpop.eup %1857 }
 0x1bb   : > { %v744_v41 = vadd.f32 %v2693_v15, %v2389_v42  ;;  %v746_v33 = vadd.f32 %v2698_v39, %v2398_v46  ;;  %v1252_v43 = vmul.f32 %v1188_v25, %v1188_v25  ;;  %v1625_v52 = vpack.c.bf16 %v1856_v27, %v1852_v1  ;;  %v1860_v4 = vpop.eup %1859 }
 0x1bc   : > { %v1283_v0 = vadd.f32 %v1233_v40, %v1232_v35  ;;  %v2997_v58 = vunpack.c.h.bf16 %v2488_v10  ;;  %v1234_v22 = vmul.f32 %v1170_v26, %v1170_v26  ;;  %v1616_v47 = vpack.c.bf16 %v1858_v50, %v1854_v37  ;;  %v1862_v49 = vpop.eup %1861 }
 0x1bd   : > { %v2998_v7 = vunpack.c.h.bf16 %v2494_v24  ;;  %1875 = vtanh.f32 %v734_v13  ;;  %1037 = vst [vmem:[%s2539_s8 + $0xb8] sm:$0xff] %v1625_v52  ;;  %v2999_v39 = vunpack.c.l.bf16 %v2503_v14  ;;  %v750_v10 = vadd.f32 %v2717_v54, %v2389_v42 }
 0x1be   : > { %v1189_v56 = vsub.f32 %v1856_v27, %v2997_v58  ;;  %v1314_v16 = vadd.f32 %v1313_v21, %v1283_v0  ;;  %1877 = vtanh.f32 %v736_v23  ;;  %1028 = vst [vmem:[%s2539_s8 + $0x70] sm:$0xff] %v1616_v47  ;;  %v752_v24 = vadd.f32 %v2723_v32, %v2398_v46  ;;  %v1864_v1 = vpop.eup %1863  ;;  %v1075_v58 = vld [vmem:[%s2375_s6 + $0xe8] sm:$0xff] }
 0x1bf   : > { %v1171_v51 = vsub.f32 %v1858_v50, %v2998_v7  ;;  %v1172_v20 = vsub.f32 %v1860_v4, %v2999_v39  ;;  %1879 = vtanh.f32 %v740_v59  ;;  %v1617_v8 = vpack.c.bf16 %v1862_v49, %v1860_v4  ;;  %v1866_v23 = vpop.eup %1865 }
 0x1c0   : > { %v1253_v15 = vmul.f32 %v1189_v56, %v1189_v56  ;;  %v3000_v44 = vunpack.c.h.bf16 %v2503_v14  ;;  %v3001_v35 = vunpack.c.l.bf16 %v2509_v19  ;;  %1881 = vtanh.f32 %v742_v34 }
 0x1c1   : > { %v1235_v62 = vmul.f32 %v1171_v51, %v1171_v51  ;;  %v1236_v61 = vmul.f32 %v1172_v20, %v1172_v20  ;;  %v754_v54 = vadd.f32 %v2728_v38, %v2389_v42  ;;  %v1868_v25 = vpop.eup %1867  ;;  %1029 = vst [vmem:[%s2539_s8 + $0x78] sm:$0xff] %v1617_v8  ;;  %v1626_v59 = vpack.c.bf16 %v1866_v23, %v1864_v1 }
 0x1c2   : > { %v2800_v13 = vadd.f32 %v1253_v15, %v1252_v43  ;;  %v1173_v9 = vsub.f32 %v1862_v49, %v3000_v44  ;;  %v1190_v29 = vsub.f32 %v1864_v1, %v3001_v35  ;;  %v3002_v21 = vunpack.c.h.bf16 %v2509_v19  ;;  %v1870_v14 = vpop.eup %1869 }
 0x1c3   : > { %v1284_v37 = vadd.f32 %v1235_v62, %v1234_v22  ;;  %1883 = vtanh.f32 %v744_v41  ;;  %v3003_v27 = vunpack.c.l.bf16 %v2515_v2  ;;  %v1872_v34 = vpop.eup %1871  ;;  %1038 = vst [vmem:[%s2539_s8 + $0xc0] sm:$0xff] %v1626_v59  ;;  %v1627_v38 = vpack.c.bf16 %v1870_v14, %v1868_v25 }
 0x1c4   : > { %v1237_v32 = vmul.f32 %v1173_v9, %v1173_v9  ;;  %v1191_v40 = vsub.f32 %v1866_v23, %v3002_v21  ;;  %v1254_v26 = vmul.f32 %v1190_v29, %v1190_v29  ;;  %1885 = vtanh.f32 %v746_v33  ;;  %v1874_v19 = vpop.eup %1873 }
 0x1c5   : > { %v1315_v5 = vadd.f32 %v1314_v16, %v1284_v37  ;;  %v1192_v50 = vsub.f32 %v1868_v25, %v3003_v27  ;;  %v3004_v43 = vunpack.c.h.bf16 %v2515_v2  ;;  %v1194_v41 = vsub.f32 %v1872_v34, %v1130_v60  ;;  %1039 = vst [vmem:[%s2539_s8 + $0xc8] sm:$0xff] %v1627_v38  ;;  %v1077_v37 = vld [vmem:[%s2375_s6 + $0xf8] sm:$0xff] }
 0x1c6   : > { %v1285_v0 = vadd.f32 %v1237_v32, %v1236_v61  ;;  %v1255_v42 = vmul.f32 %v1191_v40, %v1191_v40  ;;  %1887 = vtanh.f32 %v750_v10  ;;  %v756_v4 = vadd.f32 %v2732_v28, %v2398_v46  ;;  %v1076_v28 = vld [vmem:[%s2375_s6 + $0xf0] sm:$0xff] }
 0x1c7   : > { %v1193_v52 = vsub.f32 %v1870_v14, %v3004_v43  ;;  %v1256_v56 = vmul.f32 %v1192_v50, %v1192_v50  ;;  %v1628_v7 = vpack.c.bf16 %v1874_v19, %v1872_v34  ;;  %v1876_v2 = vpop.eup %1875  ;;  %v1258_v51 = vmul.f32 %v1194_v41, %v1194_v41 }
 0x1c8   : > { %v1316_v33 = vadd.f32 %v1315_v5, %v1285_v0  ;;  %v2821_v22 = vadd.f32 %v1255_v42, %v1254_v26  ;;  %v1195_v16 = vsub.f32 %v1874_v19, %v1131_v12  ;;  %v1136_v15 = vunpack.c.l.bf16 %v1075_v58  ;;  %v1878_v60 = vpop.eup %1877 }
 0x1c9   : > { %v1257_v47 = vmul.f32 %v1193_v52, %v1193_v52  ;;  %1889 = vtanh.f32 %v752_v24  ;;  %1040 = vst [vmem:[%s2539_s8 + $0xd0] sm:$0xff] %v1628_v7  ;;  %v1196_v46 = vsub.f32 %v1876_v2, %v1132_v3  ;;  %v1880_v49 = vpop.eup %1879  ;;  %v1629_v10 = vpack.c.bf16 %v1878_v60, %v1876_v2 }
 0x1ca   : > { %v1317_v39 = vadd.f32 %v1316_v33, %v2580_v30  ;;  %1891 = vtanh.f32 %v754_v54  ;;  %v1259_v62 = vmul.f32 %v1195_v16, %v1195_v16  ;;  %v1197_v63 = vsub.f32 %v1878_v60, %v1133_v57  ;;  %v1882_v61 = vpop.eup %1881 }
 0x1cb   : > { %v2827_v20 = vadd.f32 %v1257_v47, %v1256_v56  ;;  %1893 = vtanh.f32 %v756_v4  ;;  %v1260_v30 = vmul.f32 %v1196_v46, %v1196_v46  ;;  %v1198_v24 = vsub.f32 %v1880_v49, %v1134_v31  ;;  %1041 = vst [vmem:[%s2539_s8 + $0xd8] sm:$0xff] %v1629_v10 }
 0x1cc   : > { %v1318_v12 = vadd.f32 %v1317_v39, %v2582_v36  ;;  %v1137_v1 = vunpack.c.h.bf16 %v1075_v58  ;;  %v2838_v3 = vadd.f32 %v1259_v62, %v1258_v51  ;;  %v1261_v8 = vmul.f32 %v1197_v63, %v1197_v63 }
 0x1cd   : > { %v1138_v44 = vunpack.c.l.bf16 %v1076_v28  ;;  %v1884_v9 = vpop.eup %1883  ;;  %v1262_v57 = vmul.f32 %v1198_v24, %v1198_v24  ;;  %v1630_v23 = vpack.c.bf16 %v1882_v61, %v1880_v49  ;;  %v1199_v36 = vsub.f32 %v1882_v61, %v1135_v17 }
 0x1ce   : > { %v1319_v11 = vadd.f32 %v1318_v12, %v2621_v6  ;;  %v1886_v35 = vpop.eup %1885  ;;  %v2845_v31 = vadd.f32 %v1261_v8, %v1260_v30  ;;  %v1200_v29 = vsub.f32 %v1884_v9, %v1136_v15  ;;  %v1139_v40 = vunpack.c.h.bf16 %v1076_v28 }
 0x1cf   : > { %1042 = vst [vmem:[%s2539_s8 + $0xe0] sm:$0xff] %v1630_v23  ;;  %v1263_v25 = vmul.f32 %v1199_v36, %v1199_v36  ;;  %v1631_v32 = vpack.c.bf16 %v1886_v35, %v1884_v9  ;;  %v1201_v59 = vsub.f32 %v1886_v35, %v1137_v1  ;;  %v1140_v48 = vunpack.c.l.bf16 %v1077_v37 }
 0x1d0   : > { %v1320_v54 = vadd.f32 %v1319_v11, %v2680_v53  ;;  %v1888_v6 = vpop.eup %1887  ;;  %v1264_v21 = vmul.f32 %v1200_v29, %v1200_v29  ;;  %v1141_v14 = vunpack.c.h.bf16 %v1077_v37 }
 0x1d1   : > { %v1298_v5 = vadd.f32 %v1263_v25, %v1262_v57  ;;  %1043 = vst [vmem:[%s2539_s8 + $0xe8] sm:$0xff] %v1631_v32  ;;  %v1265_v26 = vmul.f32 %v1201_v59, %v1201_v59  ;;  %v1202_v27 = vsub.f32 %v1888_v6, %v1138_v44 }
 0x1d2   : > { %v1321_v17 = vadd.f32 %v1320_v54, %v2713_v55 }
 0x1d3   : > { %v1890_v53 = vpop.eup %1889  ;;  %v1299_v0 = vadd.f32 %v1265_v26, %v1264_v21  ;;  %v1266_v38 = vmul.f32 %v1202_v27, %v1202_v27 }
 0x1d4   : > { %v1892_v50 = vpop.eup %1891  ;;  %v1322_v34 = vadd.f32 %v1321_v17, %v2735_v18  ;;  %v1632_v42 = vpack.c.bf16 %v1890_v53, %v1888_v6  ;;  %v1203_v43 = vsub.f32 %v1890_v53, %v1139_v40 }
 0x1d5   : > { %v1894_v55 = vpop.eup %1893  ;;  %v1204_v52 = vsub.f32 %v1892_v50, %v1140_v48 }
 0x1d6   : > { %v1323_v18 = vadd.f32 %v1322_v34, %v2756_v45  ;;  %1044 = vst [vmem:[%s2539_s8 + $0xf0] sm:$0xff] %v1632_v42  ;;  %v1633_v58 = vpack.c.bf16 %v1894_v55, %v1892_v50  ;;  %v1205_v19 = vsub.f32 %v1894_v55, %v1141_v14  ;;  %v1267_v56 = vmul.f32 %v1203_v43, %v1203_v43 }
 0x1d7   : > { %v1268_v41 = vmul.f32 %v1204_v52, %v1204_v52 }
 0x1d8   : > { %v1324_v4 = vadd.f32 %v1323_v18, %v2800_v13  ;;  %1045 = vst [vmem:[%s2539_s8 + $0xf8] sm:$0xff] %v1633_v58  ;;  %v1269_v33 = vmul.f32 %v1205_v19, %v1205_v19 }
 0x1d9   : > { %1996 = shalt.err (!%p1993_p8)
}
 0x1da   : > { %s1997_s27 = scalar_lea.hbm %s2859_s24, 4096  ;;  %s2001_s6 = scalar_lea.hbm %s2949_s4, 8192 }
 0x1db   : > { %p1998_p9 = scmp.ne.s32.totalorder %s2859_s24, %s1997_s27  ;;  %p2002_p1 = scmp.lt.u32.totalorder %s2859_s24, %s2949_s4 }
 0x1dc   : > { %p2003_p12 = scmp.lt.u32.totalorder %s2001_s6, %s1997_s27  ;;  %p2005_p6 = scmp.lt.u32.totalorder %s1997_s27, %s2859_s24 }
 0x1dd   : > { %p1999_p4 = pnand %p1998_p9, %p3005_p11 }
 0x1de   : > { %p2004_p0 = por %p2003_p12, %p2002_p1 }
 0x1df   : > { %p2000_p7 = pneg %p1999_p4 }
 0x1e0   : > { %p2006_p13 = por %p2005_p6, %p2004_p0 }
 0x1e2   : > { %p2007_p3 = pnand %p2006_p13, %p2000_p7 }
 0x1e4   : > { %2010 = shalt.err (!%p2007_p3)
}
 0x1e5   : > { %s2097_s28 = smov 128   ;;  %s2098_s10 = smov 256   ;;  %v1300_v45 = vadd.f32 %v1267_v56, %v1266_v38  ;;  %v1325_v13 = vadd.f32 %v1324_v4, %v2821_v22  ;;  %v1301_v47 = vadd.f32 %v1269_v33, %v1268_v41 }
 0x1e6   : > { %s2099_s13 = smov 8   ;;  %s1527_s7 = sshll.u32 %s2327_s26, 3 }
 0x1e7   : > { %1659 = dma.vmem_to_hbm [thread:$0]  (%p3005_p11), %s2861_s17, 4096, %s2859_s24, %s1335_s16, %s2097_s28, %s2098_s10, %s2099_s13   ;;  %v1326_v7 = vadd.f32 %v1325_v13, %v2827_v20 }
 0x1e8   : > { %s319_s11 = scalar_lea.vmem [#allocation9], %s1527_s7  ;;  %s2901_s16 = scalar_lea.hbm %s2950_s5, %s1634_s15 }
 0x1e9   : > { %v1327_v2 = vadd.f32 %v1326_v7, %v2838_v3  ;;  %s1369_s27 = sshll.u32 %s319_s11, 4  ;;  %s1340_s14 = scalar_lea.sflag [#allocation10], %s2327_s26  ;;  %s2903_s27 = int_to_ptr.vmem [resolvable:$true] %s1369_s27 }
 0x1ea   : > { %s2011_s12 = scalar_lea.vmem %s2903_s27, 128  ;;  %s2100_s6 = smov [#allocation9]  }
 0x1eb   : > { %v1328_v51 = vadd.f32 %v1327_v2, %v2845_v31  ;;  %p2012_p2 = scmp.ne.s32.totalorder %s2903_s27, %s2011_s12  ;;  %s2015_s8 = sshll.u32 %s2100_s6, 4  ;;  %s2016_s8 = int_to_ptr.vmem [resolvable:$false] %s2015_s8 }
 0x1ec   : > { %s2017_s23 = scalar_lea.vmem %s2016_s8, 256  ;;  %p2018_p8 = scmp.lt.s32.totalorder %s2903_s27, %s2016_s8 }
 0x1ed   : > { %v1329_v16 = vadd.f32 %v1328_v51, %v1298_v5  ;;  %p2013_p5 = pnand %p2012_p2, %p3005_p11  ;;  %p2019_p9 = scmp.lt.s32.totalorder %s2017_s23, %s2011_s12 }
 0x1ef   : > { %v1330_v15 = vadd.f32 %v1329_v16, %v1299_v0  ;;  %p2014_p10 = pneg %p2013_p5  ;;  %p2020_p4 = por %p2019_p9, %p2018_p8 }
 0x1f1   : > { %v1331_v60 = vadd.f32 %v1330_v15, %v1300_v45  ;;  %p2021_p7 = pnand %p2020_p4, %p2014_p10 }
 0x1f3   : > { %v1332_v39 = vadd.f32 %v1331_v60, %v1301_v47 }
 0x1f5   : > { %1333 = vst [vmem:[%s319_s11] sm:$0xff] %v1332_v39 }
 0x1f6   : > { %2024 = shalt.err (!%p2021_p7)
}
 0x1f7   : > { %s2025_s26 = scalar_lea.hbm %s2901_s16, 128  ;;  %s2029_s28 = scalar_lea.hbm %s2950_s5, 256 }
 0x1f8   : > { %p2026_p1 = scmp.ne.s32.totalorder %s2901_s16, %s2025_s26  ;;  %p2030_p6 = scmp.lt.u32.totalorder %s2901_s16, %s2950_s5 }
 0x1f9   : > { %p2031_p13 = scmp.lt.u32.totalorder %s2029_s28, %s2025_s26  ;;  %p2033_p2 = scmp.lt.u32.totalorder %s2025_s26, %s2901_s16 }
 0x1fa   : > { %p2027_p12 = pnand %p2026_p1, %p3005_p11 }
 0x1fb   : > { %p2032_p3 = por %p2031_p13, %p2030_p6 }
 0x1fc   : > { %p2028_p0 = pneg %p2027_p12 }
 0x1fd   : > { %p2034_p5 = por %p2033_p2, %p2032_p3 }
 0x1ff   : > { %p2035_p10 = pnand %p2034_p5, %p2028_p0 }
 0x201   : > { %2038 = shalt.err (!%p2035_p10)
}
 0x202   : > { %1660 = dma.vmem_to_hbm [thread:$0]  (%p3005_p11), %s2903_s27, 128, %s2901_s16, %s1340_s14  }
 0x203 PF: > { %s1381_s7 = sand.u32 1, %s2073_s18   ;;  %p3006_p8 = scmp.ne.s32.totalorder %s2959_s9, 0 }
 0x204   : > { %p3007_p9 = scmp.ge.s32.totalorder %s2085_s21, 2  ;;  %s1382_s11 = scalar_lea.sflag [#allocation4], %s1381_s7 }
 0x206   : > { %p1675_p4 = pnand %p3007_p9, %p3006_p8 }
 0x208   : > { %2064 = dma.done.wait (!%p1675_p4), %s1382_s11, 4096  }
 0x209   : > { %2066 = vsyncadd (!%p1675_p4), %s1382_s11, 4294963200  ;;  %s1391_s17 = scalar_lea.sflag [#allocation10], %s1381_s7 }
 0x20a   : > { %2068 = dma.done.wait (!%p1675_p4), %s1391_s17, 128  }
 0x20b   : > { %2070 = vsyncadd (!%p1675_p4), %s1391_s17, 4294967168  ;;  %p23_p11 = scmp.ge.s32.totalorder %s2152_s22, 4   ;;  %s3008_s18 = smov %s2077_s19 }
 0x20c   : > { %s3009_s19 = smov %s2081_s20  ;;  %s3010_s20 = smov %s2163_s25 }
 0x20d   : > { %s3011_s21 = smov %s2152_s22  ;;  %25 = sbr.rel (!%p23_p11) target bundleno = 8 (0x8), region = 117 }
 0x214   :  { %1396 = vsyncpa [#allocation3], 1 }
 0x215   :  { %1398 = vsyncpa [#allocation3 + $0x1], 1 }
 0x216   :  { %1399 = vsyncpa [#allocation6], 1 }
 0x217   :  { %1401 = vsyncpa [#allocation6 + $0x1], 1 }
 0x218   :  { %1402 = vsyncpa [#allocation4], 1 }
 0x219   :  { %1404 = vsyncpa [#allocation4 + $0x1], 1 }
 0x21a   :  { %1405 = vsyncpa [#allocation10], 1 }
 0x21b   :  { %1407 = vsyncpa [#allocation10 + $0x1], 1 }

</bundles_post_ra>
